<compile_context>
chip_gen: v5e
topology: v5e:2x2
jax: 0.10.0
libtpu: 0.0.40
codegen_flags: <defaults>
</compile_context>

<pallas_src>
import functools

import jax
import jax.numpy as jnp
from jax.experimental import pallas as pl
from jax.experimental.pallas import tpu as pltpu


# --------------------------------- kernel ------------------------------------

def _vmem():
    return pl.BlockSpec(memory_space=pltpu.MemorySpace.VMEM)


def _make_fused_dbn_kernel(n_up, cd_k, batch, n_vis_top, n_hid_top):
    """Build the fused DBN forward kernel.

    Input refs (in order):
      [0]                       v_input                         (B, n_vis_0)
      for i in range(n_up):     Wt_i (nv_i, nh_i), hb_i (1, nh_i), u_i (B, nh_i)
      top RBM:                  W (nh, nv), Wt (nv, nh), vb (1, nv), hb (1, nh),
                                u_h (cd_k, B, nh), u_v (cd_k, B, nv)
    Output refs: v_top (B, nv), v_last (B, nv)
    """

    def kernel(*refs):
        pos = 0
        v = refs[pos][...]
        pos += 1

        # ---- propagate up through the lower RBMs (sampled hidden states) ----
        for _ in range(n_up):
            wt = refs[pos][...]          # pre-transposed weight (nv_i, nh_i)
            hb = refs[pos + 1][...]      # (1, nh_i)
            u = refs[pos + 2][...]       # (B, nh_i)
            pos += 3
            p_h = jax.nn.sigmoid(
                jnp.dot(v, wt, preferred_element_type=jnp.float32) + hb)
            # TODO(synk): torch.bernoulli's exact RNG stream is not reproduced;
            # this is a statistically equivalent Bernoulli(p) draw.
            v = (u < p_h).astype(jnp.float32)

        # ---- CD-k Gibbs chain on the top RBM ----
        w = refs[pos][...]               # (nh, nv)
        wt = refs[pos + 1][...]          # (nv, nh), pre-transposed (no XLU work)
        vb = refs[pos + 2][...]          # (1, nv)
        hb = refs[pos + 3][...]          # (1, nh)
        u_h_ref = refs[pos + 4]          # (cd_k, B, nh)
        u_v_ref = refs[pos + 5]          # (cd_k, B, nv)
        v_out_ref = refs[pos + 6]
        v_last_ref = refs[pos + 7]

        v_out_ref[...] = v

        # Hoisted bias broadcasts (JAX does not CSE broadcast_in_dim).
        hb_b = jnp.broadcast_to(hb, (batch, n_hid_top))
        vb_b = jnp.broadcast_to(vb, (batch, n_vis_top))

        def v_to_h(v_cur, u):
            p = jax.nn.sigmoid(
                jnp.dot(v_cur, wt, preferred_element_type=jnp.float32) + hb_b)
            return (u < p).astype(jnp.float32)

        def h_to_v(h_cur, u):
            p = jax.nn.sigmoid(
                jnp.dot(h_cur, w, preferred_element_type=jnp.float32) + vb_b)
            return (u < p).astype(jnp.float32)

        # Fully unrolled chain; the trailing (discarded) v_to_h of the PyTorch
        # reference loop is omitted since its result is never used.
        h = v_to_h(v, u_h_ref[0])
        v_last = v
        for k in range(cd_k):
            v_last = h_to_v(h, u_v_ref[k])
            if k < cd_k - 1:
                h = v_to_h(v_last, u_h_ref[k + 1])
        v_last_ref[...] = v_last

    return kernel


# -------------------------------- wrapper ------------------------------------

@functools.partial(jax.jit, static_argnames=("ith_layer", "cd_k"))
def dbn_forward(v_input, Ws, v_biases, h_biases, key, *, ith_layer, cd_k):
    assert cd_k >= 1, "CD_k must be >= 1"
    B = v_input.shape[0]
    n_up = ith_layer
    keys = jax.random.split(key, n_up + 2)

    inputs = [v_input.astype(jnp.float32)]
    for i in range(n_up):
        W = Ws[i]
        nh = W.shape[0]
        u = jax.random.uniform(keys[i], (B, nh), jnp.float32)
        inputs += [W.T, h_biases[i].reshape(1, -1), u]

    W_top = Ws[ith_layer]
    nh_top, nv_top = W_top.shape
    u_h = jax.random.uniform(keys[n_up], (cd_k, B, nh_top), jnp.float32)
    u_v = jax.random.uniform(keys[n_up + 1], (cd_k, B, nv_top), jnp.float32)
    inputs += [W_top, W_top.T,
               v_biases[ith_layer].reshape(1, -1),
               h_biases[ith_layer].reshape(1, -1),
               u_h, u_v]

    kern = _make_fused_dbn_kernel(n_up, cd_k, B, nv_top, nh_top)
    out_shape = (jax.ShapeDtypeStruct((B, nv_top), jnp.float32),
                 jax.ShapeDtypeStruct((B, nv_top), jnp.float32))
    return pl.pallas_call(
        kern,
        out_shape=out_shape,
        in_specs=[_vmem()] * len(inputs),
        out_specs=(_vmem(), _vmem()),
    )(*inputs)


class DBNPallas:
    """JAX/Pallas equivalent of the PyTorch DBN module (forward pass only)."""

    def __init__(self, n_visible=256, n_hidden=(100, 64), key=None):
        if key is None:
            key = jax.random.PRNGKey(0)
        self.n_layers = len(n_hidden)
        self.Ws, self.v_biases, self.h_biases = [], [], []
        sizes_in = [n_visible] + list(n_hidden[:-1])
        for nv, nh in zip(sizes_in, n_hidden):
            key, sub = jax.random.split(key)
            bound = 1.0 / (nv + nh)
            # W ~ Uniform(-1/(nv+nh), 1/(nv+nh)); biases zero (as in RBM.__init__)
            self.Ws.append(jax.random.uniform(sub, (nh, nv), jnp.float32,
                                              -bound, bound))
            self.v_biases.append(jnp.zeros((nv,), jnp.float32))
            self.h_biases.append(jnp.zeros((nh,), jnp.float32))

    def forward(self, v_input, ith_layer, CD_k=10, key=None):
        if key is None:
            key = jax.random.PRNGKey(0)
        return dbn_forward(v_input, self.Ws, self.v_biases, self.h_biases, key,
                           ith_layer=ith_layer, cd_k=CD_k)


# ----------------------------------- main ------------------------------------

if __name__ == "__main__":
    key = jax.random.PRNGKey(0)
    k_model, k_in, k_fwd = jax.random.split(key, 3)

    B = 8
    n_visible = 128
    n_hidden = (64, 32)

    dbn = DBNPallas(n_visible=n_visible, n_hidden=n_hidden, key=k_model)
    v_input = (jax.random.uniform(k_in, (B, n_visible)) < 0.5).astype(jnp.float32)

    v, v_ = dbn.forward(v_input, ith_layer=1, CD_k=10, key=k_fwd)
    jax.block_until_ready((v, v_))

    assert v.shape == (B, n_hidden[0]), v.shape
    assert v_.shape == (B, n_hidden[0]), v_.shape
    assert bool(jnp.all((v == 0.0) | (v == 1.0)))
    assert bool(jnp.all((v_ == 0.0) | (v_ == 1.0)))
    print("KERNEL_OK")
</pallas_src>

<mosaic_0001>
module attributes {stable_mosaic.version = 11 : i64} {
  func.func @kernel(%arg0: memref<8x128xf32, #tpu.memory_space<vmem>>, %arg1: memref<128x64xf32, #tpu.memory_space<vmem>>, %arg2: memref<1x64xf32, #tpu.memory_space<vmem>>, %arg3: memref<8x64xf32, #tpu.memory_space<vmem>>, %arg4: memref<32x64xf32, #tpu.memory_space<vmem>>, %arg5: memref<64x32xf32, #tpu.memory_space<vmem>>, %arg6: memref<1x64xf32, #tpu.memory_space<vmem>>, %arg7: memref<1x32xf32, #tpu.memory_space<vmem>>, %arg8: memref<10x8x32xf32, #tpu.memory_space<vmem>>, %arg9: memref<10x8x64xf32, #tpu.memory_space<vmem>>, %arg10: memref<8x64xf32, #tpu.memory_space<vmem>>, %arg11: memref<8x64xf32, #tpu.memory_space<vmem>>) attributes {dimension_semantics = [], scalar_prefetch = 0 : i64, scratch_operands = 0 : i64, tpu.core_type = #tpu.core_type<tc>} {
    %c0 = arith.constant 0 : index
    %c0_0 = arith.constant 0 : index
    %0 = vector.load %arg0[%c0, %c0_0] : memref<8x128xf32, #tpu.memory_space<vmem>>, vector<8x128xf32>
    %c0_1 = arith.constant 0 : index
    %c0_2 = arith.constant 0 : index
    %1 = vector.load %arg1[%c0_1, %c0_2] : memref<128x64xf32, #tpu.memory_space<vmem>>, vector<128x64xf32>
    %c0_3 = arith.constant 0 : index
    %c0_4 = arith.constant 0 : index
    %2 = vector.load %arg2[%c0_3, %c0_4] : memref<1x64xf32, #tpu.memory_space<vmem>>, vector<1x64xf32>
    %c0_5 = arith.constant 0 : index
    %c0_6 = arith.constant 0 : index
    %3 = vector.load %arg3[%c0_5, %c0_6] : memref<8x64xf32, #tpu.memory_space<vmem>>, vector<8x64xf32>
    %cst = arith.constant dense<0.000000e+00> : vector<8x64xf32>
    %4 = tpu.matmul %0, %1, %cst {dimension_numbers = #tpu.dot_dimension_numbers<[1], [0], [0], [1], [0, 0, 1, 1], [], []>} : vector<8x128xf32>, vector<128x64xf32>, vector<8x64xf32> -> vector<8x64xf32>
    %5 = vector.broadcast %2 : vector<1x64xf32> to vector<8x64xf32>
    %6 = arith.addf %4, %5 : vector<8x64xf32>
    %7 = arith.negf %6 : vector<8x64xf32>
    %8 = math.exp %7 : vector<8x64xf32>
    %cst_7 = arith.constant 1.000000e+00 : f32
    %9 = vector.broadcast %cst_7 : f32 to vector<8x64xf32>
    %10 = arith.addf %9, %8 : vector<8x64xf32>
    %11 = arith.divf %9, %10 : vector<8x64xf32>
    %12 = arith.cmpf olt, %3, %11 : vector<8x64xf32>
    %13 = arith.extui %12 : vector<8x64xi1> to vector<8x64xi32>
    %14 = arith.sitofp %13 : vector<8x64xi32> to vector<8x64xf32>
    %c0_8 = arith.constant 0 : index
    %c0_9 = arith.constant 0 : index
    %15 = vector.load %arg4[%c0_8, %c0_9] : memref<32x64xf32, #tpu.memory_space<vmem>>, vector<32x64xf32>
    %c0_10 = arith.constant 0 : index
    %c0_11 = arith.constant 0 : index
    %16 = vector.load %arg5[%c0_10, %c0_11] : memref<64x32xf32, #tpu.memory_space<vmem>>, vector<64x32xf32>
    %c0_12 = arith.constant 0 : index
    %c0_13 = arith.constant 0 : index
    %17 = vector.load %arg6[%c0_12, %c0_13] : memref<1x64xf32, #tpu.memory_space<vmem>>, vector<1x64xf32>
    %c0_14 = arith.constant 0 : index
    %c0_15 = arith.constant 0 : index
    %18 = vector.load %arg7[%c0_14, %c0_15] : memref<1x32xf32, #tpu.memory_space<vmem>>, vector<1x32xf32>
    %c0_16 = arith.constant 0 : index
    %c0_17 = arith.constant 0 : index
    %19 = vector.load %arg10[%c0_16, %c0_17] : memref<8x64xf32, #tpu.memory_space<vmem>>, vector<8x64xf32>
    tpu.vector_store %arg10[%c0_16, %c0_17], %14 {strides = array<i32>} : memref<8x64xf32, #tpu.memory_space<vmem>>, vector<8x64xf32>,
    %20 = vector.shape_cast %18 : vector<1x32xf32> to vector<1x32xf32>
    %21 = vector.broadcast %20 : vector<1x32xf32> to vector<8x32xf32>
    %22 = vector.shape_cast %17 : vector<1x64xf32> to vector<1x64xf32>
    %23 = vector.broadcast %22 : vector<1x64xf32> to vector<8x64xf32>
    %c0_18 = arith.constant 0 : index
    %c0_19 = arith.constant 0 : index
    %c0_20 = arith.constant 0 : index
    %24 = vector.load %arg8[%c0_18, %c0_19, %c0_20] : memref<10x8x32xf32, #tpu.memory_space<vmem>>, vector<1x8x32xf32>
    %25 = vector.shape_cast %24 : vector<1x8x32xf32> to vector<8x32xf32>
    %cst_21 = arith.constant dense<0.000000e+00> : vector<8x32xf32>
    %26 = tpu.matmul %14, %16, %cst_21 {dimension_numbers = #tpu.dot_dimension_numbers<[1], [0], [0], [1], [0, 0, 1, 1], [], []>} : vector<8x64xf32>, vector<64x32xf32>, vector<8x32xf32> -> vector<8x32xf32>
    %27 = arith.addf %26, %21 : vector<8x32xf32>
    %28 = arith.negf %27 : vector<8x32xf32>
    %29 = math.exp %28 : vector<8x32xf32>
    %cst_22 = arith.constant 1.000000e+00 : f32
    %30 = vector.broadcast %cst_22 : f32 to vector<8x32xf32>
    %31 = arith.addf %30, %29 : vector<8x32xf32>
    %32 = arith.divf %30, %31 : vector<8x32xf32>
    %33 = arith.cmpf olt, %25, %32 : vector<8x32xf32>
    %34 = arith.extui %33 : vector<8x32xi1> to vector<8x32xi32>
    %35 = arith.sitofp %34 : vector<8x32xi32> to vector<8x32xf32>
    %c0_23 = arith.constant 0 : index
    %c0_24 = arith.constant 0 : index
    %c0_25 = arith.constant 0 : index
    %36 = vector.load %arg9[%c0_23, %c0_24, %c0_25] : memref<10x8x64xf32, #tpu.memory_space<vmem>>, vector<1x8x64xf32>
    %37 = vector.shape_cast %36 : vector<1x8x64xf32> to vector<8x64xf32>
    %cst_26 = arith.constant dense<0.000000e+00> : vector<8x64xf32>
    %38 = tpu.matmul %35, %15, %cst_26 {dimension_numbers = #tpu.dot_dimension_numbers<[1], [0], [0], [1], [0, 0, 1, 1], [], []>} : vector<8x32xf32>, vector<32x64xf32>, vector<8x64xf32> -> vector<8x64xf32>
    %39 = arith.addf %38, %23 : vector<8x64xf32>
    %40 = arith.negf %39 : vector<8x64xf32>
    %41 = math.exp %40 : vector<8x64xf32>
    %cst_27 = arith.constant 1.000000e+00 : f32
    %42 = vector.broadcast %cst_27 : f32 to vector<8x64xf32>
    %43 = arith.addf %42, %41 : vector<8x64xf32>
    %44 = arith.divf %42, %43 : vector<8x64xf32>
    %45 = arith.cmpf olt, %37, %44 : vector<8x64xf32>
    %46 = arith.extui %45 : vector<8x64xi1> to vector<8x64xi32>
    %47 = arith.sitofp %46 : vector<8x64xi32> to vector<8x64xf32>
    %c1 = arith.constant 1 : index
    %c0_28 = arith.constant 0 : index
    %c0_29 = arith.constant 0 : index
    %48 = vector.load %arg8[%c1, %c0_28, %c0_29] : memref<10x8x32xf32, #tpu.memory_space<vmem>>, vector<1x8x32xf32>
    %49 = vector.shape_cast %48 : vector<1x8x32xf32> to vector<8x32xf32>
    %cst_30 = arith.constant dense<0.000000e+00> : vector<8x32xf32>
    %50 = tpu.matmul %47, %16, %cst_30 {dimension_numbers = #tpu.dot_dimension_numbers<[1], [0], [0], [1], [0, 0, 1, 1], [], []>} : vector<8x64xf32>, vector<64x32xf32>, vector<8x32xf32> -> vector<8x32xf32>
    %51 = arith.addf %50, %21 : vector<8x32xf32>
    %52 = arith.negf %51 : vector<8x32xf32>
    %53 = math.exp %52 : vector<8x32xf32>
    %cst_31 = arith.constant 1.000000e+00 : f32
    %54 = vector.broadcast %cst_31 : f32 to vector<8x32xf32>
    %55 = arith.addf %54, %53 : vector<8x32xf32>
    %56 = arith.divf %54, %55 : vector<8x32xf32>
    %57 = arith.cmpf olt, %49, %56 : vector<8x32xf32>
    %58 = arith.extui %57 : vector<8x32xi1> to vector<8x32xi32>
    %59 = arith.sitofp %58 : vector<8x32xi32> to vector<8x32xf32>
    %c1_32 = arith.constant 1 : index
    %c0_33 = arith.constant 0 : index
    %c0_34 = arith.constant 0 : index
    %60 = vector.load %arg9[%c1_32, %c0_33, %c0_34] : memref<10x8x64xf32, #tpu.memory_space<vmem>>, vector<1x8x64xf32>
    %61 = vector.shape_cast %60 : vector<1x8x64xf32> to vector<8x64xf32>
    %cst_35 = arith.constant dense<0.000000e+00> : vector<8x64xf32>
    %62 = tpu.matmul %59, %15, %cst_35 {dimension_numbers = #tpu.dot_dimension_numbers<[1], [0], [0], [1], [0, 0, 1, 1], [], []>} : vector<8x32xf32>, vector<32x64xf32>, vector<8x64xf32> -> vector<8x64xf32>
    %63 = arith.addf %62, %23 : vector<8x64xf32>
    %64 = arith.negf %63 : vector<8x64xf32>
    %65 = math.exp %64 : vector<8x64xf32>
    %cst_36 = arith.constant 1.000000e+00 : f32
    %66 = vector.broadcast %cst_36 : f32 to vector<8x64xf32>
    %67 = arith.addf %66, %65 : vector<8x64xf32>
    %68 = arith.divf %66, %67 : vector<8x64xf32>
    %69 = arith.cmpf olt, %61, %68 : vector<8x64xf32>
    %70 = arith.extui %69 : vector<8x64xi1> to vector<8x64xi32>
    %71 = arith.sitofp %70 : vector<8x64xi32> to vector<8x64xf32>
    %c2 = arith.constant 2 : index
    %c0_37 = arith.constant 0 : index
    %c0_38 = arith.constant 0 : index
    %72 = vector.load %arg8[%c2, %c0_37, %c0_38] : memref<10x8x32xf32, #tpu.memory_space<vmem>>, vector<1x8x32xf32>
    %73 = vector.shape_cast %72 : vector<1x8x32xf32> to vector<8x32xf32>
    %cst_39 = arith.constant dense<0.000000e+00> : vector<8x32xf32>
    %74 = tpu.matmul %71, %16, %cst_39 {dimension_numbers = #tpu.dot_dimension_numbers<[1], [0], [0], [1], [0, 0, 1, 1], [], []>} : vector<8x64xf32>, vector<64x32xf32>, vector<8x32xf32> -> vector<8x32xf32>
    %75 = arith.addf %74, %21 : vector<8x32xf32>
    %76 = arith.negf %75 : vector<8x32xf32>
    %77 = math.exp %76 : vector<8x32xf32>
    %cst_40 = arith.constant 1.000000e+00 : f32
    %78 = vector.broadcast %cst_40 : f32 to vector<8x32xf32>
    %79 = arith.addf %78, %77 : vector<8x32xf32>
    %80 = arith.divf %78, %79 : vector<8x32xf32>
    %81 = arith.cmpf olt, %73, %80 : vector<8x32xf32>
    %82 = arith.extui %81 : vector<8x32xi1> to vector<8x32xi32>
    %83 = arith.sitofp %82 : vector<8x32xi32> to vector<8x32xf32>
    %c2_41 = arith.constant 2 : index
    %c0_42 = arith.constant 0 : index
    %c0_43 = arith.constant 0 : index
    %84 = vector.load %arg9[%c2_41, %c0_42, %c0_43] : memref<10x8x64xf32, #tpu.memory_space<vmem>>, vector<1x8x64xf32>
    %85 = vector.shape_cast %84 : vector<1x8x64xf32> to vector<8x64xf32>
    %cst_44 = arith.constant dense<0.000000e+00> : vector<8x64xf32>
    %86 = tpu.matmul %83, %15, %cst_44 {dimension_numbers = #tpu.dot_dimension_numbers<[1], [0], [0], [1], [0, 0, 1, 1], [], []>} : vector<8x32xf32>, vector<32x64xf32>, vector<8x64xf32> -> vector<8x64xf32>
    %87 = arith.addf %86, %23 : vector<8x64xf32>
    %88 = arith.negf %87 : vector<8x64xf32>
    %89 = math.exp %88 : vector<8x64xf32>
    %cst_45 = arith.constant 1.000000e+00 : f32
    %90 = vector.broadcast %cst_45 : f32 to vector<8x64xf32>
    %91 = arith.addf %90, %89 : vector<8x64xf32>
    %92 = arith.divf %90, %91 : vector<8x64xf32>
    %93 = arith.cmpf olt, %85, %92 : vector<8x64xf32>
    %94 = arith.extui %93 : vector<8x64xi1> to vector<8x64xi32>
    %95 = arith.sitofp %94 : vector<8x64xi32> to vector<8x64xf32>
    %c3 = arith.constant 3 : index
    %c0_46 = arith.constant 0 : index
    %c0_47 = arith.constant 0 : index
    %96 = vector.load %arg8[%c3, %c0_46, %c0_47] : memref<10x8x32xf32, #tpu.memory_space<vmem>>, vector<1x8x32xf32>
    %97 = vector.shape_cast %96 : vector<1x8x32xf32> to vector<8x32xf32>
    %cst_48 = arith.constant dense<0.000000e+00> : vector<8x32xf32>
    %98 = tpu.matmul %95, %16, %cst_48 {dimension_numbers = #tpu.dot_dimension_numbers<[1], [0], [0], [1], [0, 0, 1, 1], [], []>} : vector<8x64xf32>, vector<64x32xf32>, vector<8x32xf32> -> vector<8x32xf32>
    %99 = arith.addf %98, %21 : vector<8x32xf32>
    %100 = arith.negf %99 : vector<8x32xf32>
    %101 = math.exp %100 : vector<8x32xf32>
    %cst_49 = arith.constant 1.000000e+00 : f32
    %102 = vector.broadcast %cst_49 : f32 to vector<8x32xf32>
    %103 = arith.addf %102, %101 : vector<8x32xf32>
    %104 = arith.divf %102, %103 : vector<8x32xf32>
    %105 = arith.cmpf olt, %97, %104 : vector<8x32xf32>
    %106 = arith.extui %105 : vector<8x32xi1> to vector<8x32xi32>
    %107 = arith.sitofp %106 : vector<8x32xi32> to vector<8x32xf32>
    %c3_50 = arith.constant 3 : index
    %c0_51 = arith.constant 0 : index
    %c0_52 = arith.constant 0 : index
    %108 = vector.load %arg9[%c3_50, %c0_51, %c0_52] : memref<10x8x64xf32, #tpu.memory_space<vmem>>, vector<1x8x64xf32>
    %109 = vector.shape_cast %108 : vector<1x8x64xf32> to vector<8x64xf32>
    %cst_53 = arith.constant dense<0.000000e+00> : vector<8x64xf32>
    %110 = tpu.matmul %107, %15, %cst_53 {dimension_numbers = #tpu.dot_dimension_numbers<[1], [0], [0], [1], [0, 0, 1, 1], [], []>} : vector<8x32xf32>, vector<32x64xf32>, vector<8x64xf32> -> vector<8x64xf32>
    %111 = arith.addf %110, %23 : vector<8x64xf32>
    %112 = arith.negf %111 : vector<8x64xf32>
    %113 = math.exp %112 : vector<8x64xf32>
    %cst_54 = arith.constant 1.000000e+00 : f32
    %114 = vector.broadcast %cst_54 : f32 to vector<8x64xf32>
    %115 = arith.addf %114, %113 : vector<8x64xf32>
    %116 = arith.divf %114, %115 : vector<8x64xf32>
    %117 = arith.cmpf olt, %109, %116 : vector<8x64xf32>
    %118 = arith.extui %117 : vector<8x64xi1> to vector<8x64xi32>
    %119 = arith.sitofp %118 : vector<8x64xi32> to vector<8x64xf32>
    %c4 = arith.constant 4 : index
    %c0_55 = arith.constant 0 : index
    %c0_56 = arith.constant 0 : index
    %120 = vector.load %arg8[%c4, %c0_55, %c0_56] : memref<10x8x32xf32, #tpu.memory_space<vmem>>, vector<1x8x32xf32>
    %121 = vector.shape_cast %120 : vector<1x8x32xf32> to vector<8x32xf32>
    %cst_57 = arith.constant dense<0.000000e+00> : vector<8x32xf32>
    %122 = tpu.matmul %119, %16, %cst_57 {dimension_numbers = #tpu.dot_dimension_numbers<[1], [0], [0], [1], [0, 0, 1, 1], [], []>} : vector<8x64xf32>, vector<64x32xf32>, vector<8x32xf32> -> vector<8x32xf32>
    %123 = arith.addf %122, %21 : vector<8x32xf32>
    %124 = arith.negf %123 : vector<8x32xf32>
    %125 = math.exp %124 : vector<8x32xf32>
    %cst_58 = arith.constant 1.000000e+00 : f32
    %126 = vector.broadcast %cst_58 : f32 to vector<8x32xf32>
    %127 = arith.addf %126, %125 : vector<8x32xf32>
    %128 = arith.divf %126, %127 : vector<8x32xf32>
    %129 = arith.cmpf olt, %121, %128 : vector<8x32xf32>
    %130 = arith.extui %129 : vector<8x32xi1> to vector<8x32xi32>
    %131 = arith.sitofp %130 : vector<8x32xi32> to vector<8x32xf32>
    %c4_59 = arith.constant 4 : index
    %c0_60 = arith.constant 0 : index
    %c0_61 = arith.constant 0 : index
    %132 = vector.load %arg9[%c4_59, %c0_60, %c0_61] : memref<10x8x64xf32, #tpu.memory_space<vmem>>, vector<1x8x64xf32>
    %133 = vector.shape_cast %132 : vector<1x8x64xf32> to vector<8x64xf32>
    %cst_62 = arith.constant dense<0.000000e+00> : vector<8x64xf32>
    %134 = tpu.matmul %131, %15, %cst_62 {dimension_numbers = #tpu.dot_dimension_numbers<[1], [0], [0], [1], [0, 0, 1, 1], [], []>} : vector<8x32xf32>, vector<32x64xf32>, vector<8x64xf32> -> vector<8x64xf32>
    %135 = arith.addf %134, %23 : vector<8x64xf32>
    %136 = arith.negf %135 : vector<8x64xf32>
    %137 = math.exp %136 : vector<8x64xf32>
    %cst_63 = arith.constant 1.000000e+00 : f32
    %138 = vector.broadcast %cst_63 : f32 to vector<8x64xf32>
    %139 = arith.addf %138, %137 : vector<8x64xf32>
    %140 = arith.divf %138, %139 : vector<8x64xf32>
    %141 = arith.cmpf olt, %133, %140 : vector<8x64xf32>
    %142 = arith.extui %141 : vector<8x64xi1> to vector<8x64xi32>
    %143 = arith.sitofp %142 : vector<8x64xi32> to vector<8x64xf32>
    %c5 = arith.constant 5 : index
    %c0_64 = arith.constant 0 : index
    %c0_65 = arith.constant 0 : index
    %144 = vector.load %arg8[%c5, %c0_64, %c0_65] : memref<10x8x32xf32, #tpu.memory_space<vmem>>, vector<1x8x32xf32>
    %145 = vector.shape_cast %144 : vector<1x8x32xf32> to vector<8x32xf32>
    %cst_66 = arith.constant dense<0.000000e+00> : vector<8x32xf32>
    %146 = tpu.matmul %143, %16, %cst_66 {dimension_numbers = #tpu.dot_dimension_numbers<[1], [0], [0], [1], [0, 0, 1, 1], [], []>} : vector<8x64xf32>, vector<64x32xf32>, vector<8x32xf32> -> vector<8x32xf32>
    %147 = arith.addf %146, %21 : vector<8x32xf32>
    %148 = arith.negf %147 : vector<8x32xf32>
    %149 = math.exp %148 : vector<8x32xf32>
    %cst_67 = arith.constant 1.000000e+00 : f32
    %150 = vector.broadcast %cst_67 : f32 to vector<8x32xf32>
    %151 = arith.addf %150, %149 : vector<8x32xf32>
    %152 = arith.divf %150, %151 : vector<8x32xf32>
    %153 = arith.cmpf olt, %145, %152 : vector<8x32xf32>
    %154 = arith.extui %153 : vector<8x32xi1> to vector<8x32xi32>
    %155 = arith.sitofp %154 : vector<8x32xi32> to vector<8x32xf32>
    %c5_68 = arith.constant 5 : index
    %c0_69 = arith.constant 0 : index
    %c0_70 = arith.constant 0 : index
    %156 = vector.load %arg9[%c5_68, %c0_69, %c0_70] : memref<10x8x64xf32, #tpu.memory_space<vmem>>, vector<1x8x64xf32>
    %157 = vector.shape_cast %156 : vector<1x8x64xf32> to vector<8x64xf32>
    %cst_71 = arith.constant dense<0.000000e+00> : vector<8x64xf32>
    %158 = tpu.matmul %155, %15, %cst_71 {dimension_numbers = #tpu.dot_dimension_numbers<[1], [0], [0], [1], [0, 0, 1, 1], [], []>} : vector<8x32xf32>, vector<32x64xf32>, vector<8x64xf32> -> vector<8x64xf32>
    %159 = arith.addf %158, %23 : vector<8x64xf32>
    %160 = arith.negf %159 : vector<8x64xf32>
    %161 = math.exp %160 : vector<8x64xf32>
    %cst_72 = arith.constant 1.000000e+00 : f32
    %162 = vector.broadcast %cst_72 : f32 to vector<8x64xf32>
    %163 = arith.addf %162, %161 : vector<8x64xf32>
    %164 = arith.divf %162, %163 : vector<8x64xf32>
    %165 = arith.cmpf olt, %157, %164 : vector<8x64xf32>
    %166 = arith.extui %165 : vector<8x64xi1> to vector<8x64xi32>
    %167 = arith.sitofp %166 : vector<8x64xi32> to vector<8x64xf32>
    %c6 = arith.constant 6 : index
    %c0_73 = arith.constant 0 : index
    %c0_74 = arith.constant 0 : index
    %168 = vector.load %arg8[%c6, %c0_73, %c0_74] : memref<10x8x32xf32, #tpu.memory_space<vmem>>, vector<1x8x32xf32>
    %169 = vector.shape_cast %168 : vector<1x8x32xf32> to vector<8x32xf32>
    %cst_75 = arith.constant dense<0.000000e+00> : vector<8x32xf32>
    %170 = tpu.matmul %167, %16, %cst_75 {dimension_numbers = #tpu.dot_dimension_numbers<[1], [0], [0], [1], [0, 0, 1, 1], [], []>} : vector<8x64xf32>, vector<64x32xf32>, vector<8x32xf32> -> vector<8x32xf32>
    %171 = arith.addf %170, %21 : vector<8x32xf32>
    %172 = arith.negf %171 : vector<8x32xf32>
    %173 = math.exp %172 : vector<8x32xf32>
    %cst_76 = arith.constant 1.000000e+00 : f32
    %174 = vector.broadcast %cst_76 : f32 to vector<8x32xf32>
    %175 = arith.addf %174, %173 : vector<8x32xf32>
    %176 = arith.divf %174, %175 : vector<8x32xf32>
    %177 = arith.cmpf olt, %169, %176 : vector<8x32xf32>
    %178 = arith.extui %177 : vector<8x32xi1> to vector<8x32xi32>
    %179 = arith.sitofp %178 : vector<8x32xi32> to vector<8x32xf32>
    %c6_77 = arith.constant 6 : index
    %c0_78 = arith.constant 0 : index
    %c0_79 = arith.constant 0 : index
    %180 = vector.load %arg9[%c6_77, %c0_78, %c0_79] : memref<10x8x64xf32, #tpu.memory_space<vmem>>, vector<1x8x64xf32>
    %181 = vector.shape_cast %180 : vector<1x8x64xf32> to vector<8x64xf32>
    %cst_80 = arith.constant dense<0.000000e+00> : vector<8x64xf32>
    %182 = tpu.matmul %179, %15, %cst_80 {dimension_numbers = #tpu.dot_dimension_numbers<[1], [0], [0], [1], [0, 0, 1, 1], [], []>} : vector<8x32xf32>, vector<32x64xf32>, vector<8x64xf32> -> vector<8x64xf32>
    %183 = arith.addf %182, %23 : vector<8x64xf32>
    %184 = arith.negf %183 : vector<8x64xf32>
    %185 = math.exp %184 : vector<8x64xf32>
    %cst_81 = arith.constant 1.000000e+00 : f32
    %186 = vector.broadcast %cst_81 : f32 to vector<8x64xf32>
    %187 = arith.addf %186, %185 : vector<8x64xf32>
    %188 = arith.divf %186, %187 : vector<8x64xf32>
    %189 = arith.cmpf olt, %181, %188 : vector<8x64xf32>
    %190 = arith.extui %189 : vector<8x64xi1> to vector<8x64xi32>
    %191 = arith.sitofp %190 : vector<8x64xi32> to vector<8x64xf32>
    %c7 = arith.constant 7 : index
    %c0_82 = arith.constant 0 : index
    %c0_83 = arith.constant 0 : index
    %192 = vector.load %arg8[%c7, %c0_82, %c0_83] : memref<10x8x32xf32, #tpu.memory_space<vmem>>, vector<1x8x32xf32>
    %193 = vector.shape_cast %192 : vector<1x8x32xf32> to vector<8x32xf32>
    %cst_84 = arith.constant dense<0.000000e+00> : vector<8x32xf32>
    %194 = tpu.matmul %191, %16, %cst_84 {dimension_numbers = #tpu.dot_dimension_numbers<[1], [0], [0], [1], [0, 0, 1, 1], [], []>} : vector<8x64xf32>, vector<64x32xf32>, vector<8x32xf32> -> vector<8x32xf32>
    %195 = arith.addf %194, %21 : vector<8x32xf32>
    %196 = arith.negf %195 : vector<8x32xf32>
    %197 = math.exp %196 : vector<8x32xf32>
    %cst_85 = arith.constant 1.000000e+00 : f32
    %198 = vector.broadcast %cst_85 : f32 to vector<8x32xf32>
    %199 = arith.addf %198, %197 : vector<8x32xf32>
    %200 = arith.divf %198, %199 : vector<8x32xf32>
    %201 = arith.cmpf olt, %193, %200 : vector<8x32xf32>
    %202 = arith.extui %201 : vector<8x32xi1> to vector<8x32xi32>
    %203 = arith.sitofp %202 : vector<8x32xi32> to vector<8x32xf32>
    %c7_86 = arith.constant 7 : index
    %c0_87 = arith.constant 0 : index
    %c0_88 = arith.constant 0 : index
    %204 = vector.load %arg9[%c7_86, %c0_87, %c0_88] : memref<10x8x64xf32, #tpu.memory_space<vmem>>, vector<1x8x64xf32>
    %205 = vector.shape_cast %204 : vector<1x8x64xf32> to vector<8x64xf32>
    %cst_89 = arith.constant dense<0.000000e+00> : vector<8x64xf32>
    %206 = tpu.matmul %203, %15, %cst_89 {dimension_numbers = #tpu.dot_dimension_numbers<[1], [0], [0], [1], [0, 0, 1, 1], [], []>} : vector<8x32xf32>, vector<32x64xf32>, vector<8x64xf32> -> vector<8x64xf32>
    %207 = arith.addf %206, %23 : vector<8x64xf32>
    %208 = arith.negf %207 : vector<8x64xf32>
    %209 = math.exp %208 : vector<8x64xf32>
    %cst_90 = arith.constant 1.000000e+00 : f32
    %210 = vector.broadcast %cst_90 : f32 to vector<8x64xf32>
    %211 = arith.addf %210, %209 : vector<8x64xf32>
    %212 = arith.divf %210, %211 : vector<8x64xf32>
    %213 = arith.cmpf olt, %205, %212 : vector<8x64xf32>
    %214 = arith.extui %213 : vector<8x64xi1> to vector<8x64xi32>
    %215 = arith.sitofp %214 : vector<8x64xi32> to vector<8x64xf32>
    %c8 = arith.constant 8 : index
    %c0_91 = arith.constant 0 : index
    %c0_92 = arith.constant 0 : index
    %216 = vector.load %arg8[%c8, %c0_91, %c0_92] : memref<10x8x32xf32, #tpu.memory_space<vmem>>, vector<1x8x32xf32>
    %217 = vector.shape_cast %216 : vector<1x8x32xf32> to vector<8x32xf32>
    %cst_93 = arith.constant dense<0.000000e+00> : vector<8x32xf32>
    %218 = tpu.matmul %215, %16, %cst_93 {dimension_numbers = #tpu.dot_dimension_numbers<[1], [0], [0], [1], [0, 0, 1, 1], [], []>} : vector<8x64xf32>, vector<64x32xf32>, vector<8x32xf32> -> vector<8x32xf32>
    %219 = arith.addf %218, %21 : vector<8x32xf32>
    %220 = arith.negf %219 : vector<8x32xf32>
    %221 = math.exp %220 : vector<8x32xf32>
    %cst_94 = arith.constant 1.000000e+00 : f32
    %222 = vector.broadcast %cst_94 : f32 to vector<8x32xf32>
    %223 = arith.addf %222, %221 : vector<8x32xf32>
    %224 = arith.divf %222, %223 : vector<8x32xf32>
    %225 = arith.cmpf olt, %217, %224 : vector<8x32xf32>
    %226 = arith.extui %225 : vector<8x32xi1> to vector<8x32xi32>
    %227 = arith.sitofp %226 : vector<8x32xi32> to vector<8x32xf32>
    %c8_95 = arith.constant 8 : index
    %c0_96 = arith.constant 0 : index
    %c0_97 = arith.constant 0 : index
    %228 = vector.load %arg9[%c8_95, %c0_96, %c0_97] : memref<10x8x64xf32, #tpu.memory_space<vmem>>, vector<1x8x64xf32>
    %229 = vector.shape_cast %228 : vector<1x8x64xf32> to vector<8x64xf32>
    %cst_98 = arith.constant dense<0.000000e+00> : vector<8x64xf32>
    %230 = tpu.matmul %227, %15, %cst_98 {dimension_numbers = #tpu.dot_dimension_numbers<[1], [0], [0], [1], [0, 0, 1, 1], [], []>} : vector<8x32xf32>, vector<32x64xf32>, vector<8x64xf32> -> vector<8x64xf32>
    %231 = arith.addf %230, %23 : vector<8x64xf32>
    %232 = arith.negf %231 : vector<8x64xf32>
    %233 = math.exp %232 : vector<8x64xf32>
    %cst_99 = arith.constant 1.000000e+00 : f32
    %234 = vector.broadcast %cst_99 : f32 to vector<8x64xf32>
    %235 = arith.addf %234, %233 : vector<8x64xf32>
    %236 = arith.divf %234, %235 : vector<8x64xf32>
    %237 = arith.cmpf olt, %229, %236 : vector<8x64xf32>
    %238 = arith.extui %237 : vector<8x64xi1> to vector<8x64xi32>
    %239 = arith.sitofp %238 : vector<8x64xi32> to vector<8x64xf32>
    %c9 = arith.constant 9 : index
    %c0_100 = arith.constant 0 : index
    %c0_101 = arith.constant 0 : index
    %240 = vector.load %arg8[%c9, %c0_100, %c0_101] : memref<10x8x32xf32, #tpu.memory_space<vmem>>, vector<1x8x32xf32>
    %241 = vector.shape_cast %240 : vector<1x8x32xf32> to vector<8x32xf32>
    %cst_102 = arith.constant dense<0.000000e+00> : vector<8x32xf32>
    %242 = tpu.matmul %239, %16, %cst_102 {dimension_numbers = #tpu.dot_dimension_numbers<[1], [0], [0], [1], [0, 0, 1, 1], [], []>} : vector<8x64xf32>, vector<64x32xf32>, vector<8x32xf32> -> vector<8x32xf32>
    %243 = arith.addf %242, %21 : vector<8x32xf32>
    %244 = arith.negf %243 : vector<8x32xf32>
    %245 = math.exp %244 : vector<8x32xf32>
    %cst_103 = arith.constant 1.000000e+00 : f32
    %246 = vector.broadcast %cst_103 : f32 to vector<8x32xf32>
    %247 = arith.addf %246, %245 : vector<8x32xf32>
    %248 = arith.divf %246, %247 : vector<8x32xf32>
    %249 = arith.cmpf olt, %241, %248 : vector<8x32xf32>
    %250 = arith.extui %249 : vector<8x32xi1> to vector<8x32xi32>
    %251 = arith.sitofp %250 : vector<8x32xi32> to vector<8x32xf32>
    %c9_104 = arith.constant 9 : index
    %c0_105 = arith.constant 0 : index
    %c0_106 = arith.constant 0 : index
    %252 = vector.load %arg9[%c9_104, %c0_105, %c0_106] : memref<10x8x64xf32, #tpu.memory_space<vmem>>, vector<1x8x64xf32>
    %253 = vector.shape_cast %252 : vector<1x8x64xf32> to vector<8x64xf32>
    %cst_107 = arith.constant dense<0.000000e+00> : vector<8x64xf32>
    %254 = tpu.matmul %251, %15, %cst_107 {dimension_numbers = #tpu.dot_dimension_numbers<[1], [0], [0], [1], [0, 0, 1, 1], [], []>} : vector<8x32xf32>, vector<32x64xf32>, vector<8x64xf32> -> vector<8x64xf32>
    %255 = arith.addf %254, %23 : vector<8x64xf32>
    %256 = arith.negf %255 : vector<8x64xf32>
    %257 = math.exp %256 : vector<8x64xf32>
    %cst_108 = arith.constant 1.000000e+00 : f32
    %258 = vector.broadcast %cst_108 : f32 to vector<8x64xf32>
    %259 = arith.addf %258, %257 : vector<8x64xf32>
    %260 = arith.divf %258, %259 : vector<8x64xf32>
    %261 = arith.cmpf olt, %253, %260 : vector<8x64xf32>
    %262 = arith.extui %261 : vector<8x64xi1> to vector<8x64xi32>
    %263 = arith.sitofp %262 : vector<8x64xi32> to vector<8x64xf32>
    %c0_109 = arith.constant 0 : index
    %c0_110 = arith.constant 0 : index
    %264 = vector.load %arg11[%c0_109, %c0_110] : memref<8x64xf32, #tpu.memory_space<vmem>>, vector<8x64xf32>
    tpu.vector_store %arg11[%c0_109, %c0_110], %263 {strides = array<i32>} : memref<8x64xf32, #tpu.memory_space<vmem>>, vector<8x64xf32>,
    return
  }
}

</mosaic_0001>

<bundles_post_ra>
// kernel: dbn_forward.3
= control target key start
LH: loop header
LB: loop body
LE: loop exit
PB: predicated region body
PF: predicated region fallthrough
CT: control target
= control target key end

     0   :  { %17 = vsyncpa [#allocation3], 0  ;;  %s1764_s0 = inlined_call_operand.vmem [shape: f32[8,128], index: 0, kind: input, shape index: {}]   ;;  %s1765_s1 = inlined_call_operand.vmem [shape: f32[128,64], index: 1, kind: input, shape index: {}]   ;;  %s1766_s2 = inlined_call_operand.vmem [shape: f32[1,64], index: 2, kind: input, shape index: {}]   ;;  %s1767_s3 = inlined_call_operand.vmem [shape: f32[8,64], index: 3, kind: input, shape index: {}]   ;;  %s1768_s4 = inlined_call_operand.vmem [shape: f32[32,64], index: 4, kind: input, shape index: {}]   ;;  %s1769_s5 = inlined_call_operand.vmem [shape: f32[64,32], index: 5, kind: input, shape index: {}]   ;;  %s1770_s6 = inlined_call_operand.vmem [shape: f32[1,64], index: 6, kind: input, shape index: {}]   ;;  %s1771_s7 = inlined_call_operand.vmem [shape: f32[1,32], index: 7, kind: input, shape index: {}]   ;;  %s1772_s8 = inlined_call_operand.vmem [shape: f32[10,8,32], index: 8, kind: input, shape index: {}]   ;;  %s1773_s9 = inlined_call_operand.vmem [shape: f32[10,8,64], index: 9, kind: input, shape index: {}]   ;;  %s1774_s10 = inlined_call_operand.hbm [shape: f32[8,64], index: 10, kind: output, shape index: {0}]   ;;  %s1775_s11 = inlined_call_operand.hbm [shape: f32[8,64], index: 11, kind: output, shape index: {1}]  }
   0x1   :  { %v55_v0 = vld [vmem:[%s1765_s1 + $0x78] sm:$0xff]  ;;  %v54_v1 = vld [vmem:[%s1765_s1 + $0x70] sm:$0xff]  ;;  %v53_v2 = vld [vmem:[%s1765_s1 + $0x68] sm:$0xff] }
   0x2   :  { %61 = vmatpush.msra.mxu0 %v55_v0  ;;  %v52_v3 = vld [vmem:[%s1765_s1 + $0x60] sm:$0xff]  ;;  %v51_v4 = vld [vmem:[%s1765_s1 + $0x58] sm:$0xff] }
   0x4   :  { %62 = vmatpush.msra.mxu0 %v54_v1 }
   0x6   :  { %63 = vmatpush.msra.mxu0 %v53_v2 }
   0x8   :  { %64 = vmatpush.msra.mxu0 %v52_v3 }
   0x9   :  { %18 = vsyncpa [#allocation5], 0  ;;  %v50_v5 = vld [vmem:[%s1765_s1 + $0x50] sm:$0xff]  ;;  %v49_v6 = vld [vmem:[%s1765_s1 + $0x48] sm:$0xff]  ;;  %vm117_vm4 = vcmask 523264   ;;  %v1321_v42 = vmov 0.0  }
   0xa   :  { %65 = vmatpush.msra.mxu0 %v51_v4  ;;  %v48_v7 = vld [vmem:[%s1765_s1 + $0x40] sm:$0xff]  ;;  %v47_v8 = vld [vmem:[%s1765_s1 + $0x38] sm:$0xff]  ;;  %v46_v9 = vld [vmem:[%s1765_s1 + $0x30] sm:$0xff]  ;;  %vm172_vm10 = vcmask 261120   ;;  %s1072_s12 = sshll.u32 %s1774_s10, 4  ;;  %s1322_s13 = smov [#allocation2]   ;;  %s1073_s12 = int_to_ptr.hbm [resolvable:$true] %s1072_s12 }
   0xb   :  { %v45_v10 = vld [vmem:[%s1765_s1 + $0x28] sm:$0xff]  ;;  %v44_v11 = vld [vmem:[%s1765_s1 + $0x20] sm:$0xff]  ;;  %v43_v12 = vld [vmem:[%s1765_s1 + $0x18] sm:$0xff]  ;;  %s1070_s14 = sshll.u32 %s1322_s13, 4  ;;  %s1071_s14 = int_to_ptr.vmem [resolvable:$true] %s1070_s14 }
   0xc   :  { %66 = vmatpush.msra.mxu0 %v50_v5  ;;  %v42_v13 = vld [vmem:[%s1765_s1 + $0x10] sm:$0xff]  ;;  %v41_v14 = vld [vmem:[%s1765_s1 + $0x8] sm:$0xff]  ;;  %v40_v15 = vld [vmem:[%s1765_s1] sm:$0xff] }
   0xd   :  { %v39_v16 = vld [vmem:[%s1764_s0] sm:$0xff]  ;;  %v1438_v17 = vld [vmem:[%s1769_s5 + $0x38] sm:$0xff]  ;;  %v1443_v18 = vld [vmem:[%s1769_s5 + $0x30] sm:$0xff]  ;;  %s1083_s0 = sshll.u32 %s1775_s11, 4  ;;  %s1084_s0 = int_to_ptr.hbm [resolvable:$true] %s1083_s0 }
   0xe   :  { %67 = vmatpush.msra.mxu0 %v49_v6  ;;  %137 = vmatpush.msra.mxu1 %v1438_v17  ;;  %v1450_v19 = vld [vmem:[%s1769_s5 + $0x28] sm:$0xff]  ;;  %v1458_v20 = vld [vmem:[%s1769_s5 + $0x20] sm:$0xff]  ;;  %v1466_v21 = vld [vmem:[%s1769_s5 + $0x18] sm:$0xff] }
   0xf   :  { %231 = vmatpush.msra.mxu3 %v1438_v17  ;;  %v1474_v22 = vld [vmem:[%s1769_s5 + $0x10] sm:$0xff]  ;;  %v1482_v23 = vld [vmem:[%s1769_s5 + $0x8] sm:$0xff]  ;;  %v1490_v24 = vld [vmem:[%s1769_s5] sm:$0xff] }
  0x10   :  { %68 = vmatpush.msra.mxu0 %v48_v7  ;;  %138 = vmatpush.msra.mxu1 %v1443_v18  ;;  %v1180_v25 = vld [vmem:[%s1766_s2] ss:$0 sm:$0xff]  ;;  %v1535_v44 = vld [vmem:[%s1768_s4 + $0x18] sm:$0xff]  ;;  %v1540_v45 = vld [vmem:[%s1768_s4 + $0x10] sm:$0xff] }
  0x11   :  { %232 = vmatpush.msra.mxu3 %v1443_v18  ;;  %v57_v38 = vld [vmem:[%s1767_s3] sm:$0xff]  ;;  %188 = vmatpush.msra.mxu2 %v1535_v44  ;;  %v1547_v46 = vld [vmem:[%s1768_s4 + $0x8] sm:$0xff] }
  0x12   :  { %69 = vmatpush.msra.mxu0 %v47_v8  ;;  %139 = vmatpush.msra.mxu1 %v1450_v19  ;;  %v1554_v47 = vld [vmem:[%s1768_s4] sm:$0xff] }
  0x13   :  { %233 = vmatpush.msra.mxu3 %v1450_v19  ;;  %189 = vmatpush.msra.mxu2 %v1540_v45  ;;  %v1567_v48 = vld [vmem:[%s1771_s7] ss:$0 sm:$0xff] }
  0x14   :  { %70 = vmatpush.msra.mxu0 %v46_v9  ;;  %140 = vmatpush.msra.mxu1 %v1458_v20  ;;  %v125_v61 = vld [vmem:[%s1772_s8] sm:$0xff] }
  0x15   :  { %234 = vmatpush.msra.mxu3 %v1458_v20  ;;  %190 = vmatpush.msra.mxu2 %v1547_v46  ;;  %v1582_v2 = vld [vmem:[%s1770_s6] ss:$0 sm:$0xff] }
  0x16   :  { %71 = vmatpush.msra.mxu0 %v45_v10  ;;  %141 = vmatpush.msra.mxu1 %v1466_v21 }
  0x17   :  { %235 = vmatpush.msra.mxu3 %v1466_v21  ;;  %191 = vmatpush.msra.mxu2 %v1554_v47 }
  0x18   :  { %72 = vmatpush.msra.mxu0 %v44_v11  ;;  %142 = vmatpush.msra.mxu1 %v1474_v22 }
  0x19   :  { %236 = vmatpush.msra.mxu3 %v1474_v22  ;;  %282 = vmatpush.msrb.mxu2 %v1535_v44 }
  0x1a   :  { %73 = vmatpush.msra.mxu0 %v43_v12  ;;  %143 = vmatpush.msra.mxu1 %v1482_v23 }
  0x1b   :  { %237 = vmatpush.msra.mxu3 %v1482_v23  ;;  %283 = vmatpush.msrb.mxu2 %v1540_v45 }
  0x1c   :  { %74 = vmatpush.msra.mxu0 %v42_v13  ;;  %144 = vmatpush.msra.mxu1 %v1490_v24 }
  0x1d   :  { %238 = vmatpush.msra.mxu3 %v1490_v24  ;;  %284 = vmatpush.msrb.mxu2 %v1547_v46 }
  0x1e   :  { %75 = vmatpush.msra.mxu0 %v41_v14  ;;  %325 = vmatpush.msrb.mxu1 %v1438_v17 }
  0x1f   :  { %419 = vmatpush.msrb.mxu3 %v1438_v17  ;;  %285 = vmatpush.msrb.mxu2 %v1554_v47 }
  0x20   :  { %76 = vmatpush.msra.mxu0 %v40_v15  ;;  %326 = vmatpush.msrb.mxu1 %v1443_v18  ;;  %v171_v15 = vld [vmem:[%s1773_s9] sm:$0xff] }
  0x21   :  { %77 = vmatmul.f32.vlgmr.msra.gmra.mxu0 %v39_v16  ;;  %420 = vmatpush.msrb.mxu3 %v1443_v18 }
  0x22   :  { %513 = vmatpush.msrb.mxu0 %v1438_v17  ;;  %327 = vmatpush.msrb.mxu1 %v1450_v19 }
  0x23   :  { %421 = vmatpush.msrb.mxu3 %v1450_v19 }
  0x24   :  { %514 = vmatpush.msrb.mxu0 %v1443_v18  ;;  %328 = vmatpush.msrb.mxu1 %v1458_v20 }
  0x25   :  { %422 = vmatpush.msrb.mxu3 %v1458_v20 }
  0x26   :  { %515 = vmatpush.msrb.mxu0 %v1450_v19  ;;  %329 = vmatpush.msrb.mxu1 %v1466_v21 }
  0x27   :  { %423 = vmatpush.msrb.mxu3 %v1466_v21 }
  0x28   :  { %516 = vmatpush.msrb.mxu0 %v1458_v20  ;;  %330 = vmatpush.msrb.mxu1 %v1474_v22 }
  0x29   :  { %424 = vmatpush.msrb.mxu3 %v1474_v22 }
  0x2a   :  { %517 = vmatpush.msrb.mxu0 %v1466_v21  ;;  %331 = vmatpush.msrb.mxu1 %v1482_v23 }
  0x2b   :  { %425 = vmatpush.msrb.mxu3 %v1482_v23 }
  0x2c   :  { %518 = vmatpush.msrb.mxu0 %v1474_v22  ;;  %332 = vmatpush.msrb.mxu1 %v1490_v24 }
  0x2d   :  { %426 = vmatpush.msrb.mxu3 %v1490_v24 }
  0x2e   :  { %519 = vmatpush.msrb.mxu0 %v1482_v23 }
  0x30   :  { %520 = vmatpush.msrb.mxu0 %v1490_v24 }
  0x32   :  { %795 = vmatpush.msra.mxu0 %v1438_v17 }
  0x34   :  { %796 = vmatpush.msra.mxu0 %v1443_v18 }
  0x36   :  { %797 = vmatpush.msra.mxu0 %v1450_v19 }
  0x38   :  { %798 = vmatpush.msra.mxu0 %v1458_v20 }
  0x3a   :  { %799 = vmatpush.msra.mxu0 %v1466_v21 }
  0x3c   :  { %800 = vmatpush.msra.mxu0 %v1474_v22 }
  0x3e   :  { %801 = vmatpush.msra.mxu0 %v1482_v23 }
  0x40   :  { %802 = vmatpush.msra.mxu0 %v1490_v24 }
  0x9e   :  { %v78_v26 = vpop.f32.mrf.mxu0 }
  0x9f   :  { %v79_v27 = vadd.f32 %v1180_v25, %v78_v26 }
  0xa1   :  { %v1097_v28 = vmul.f32 -1.442695, %v79_v27 }
  0xa3   :  { %1183 = vpow2.f32 %v1097_v28 }
  0xa9   :  { %v1184_v29 = vpop.eup %1183 }
  0xaa   :  { %v84_v30 = vadd.f32 1.0, %v1184_v29 }
  0xac   :  { %1185 = vrcp.f32 %v84_v30  ;;  %v96_v34 = vand.u32 2147483648, %v84_v30  ;;  %v94_v36 = vand.u32 2147483647, %v84_v30  ;;  %vm90_vm1 = vweird.f32 %v84_v30 }
  0xae   :  { %v97_v39 = vor.u32 1.1754944e-38, %v96_v34  ;;  %vm95_vm3 = vcmp.eq.f32.partialorder %v94_v36, 8.507059e+37 }
  0xb2   :  { %v1186_v31 = vpop.eup %1185 }
  0xb3   :  { %v86_v32 = vmul.f32 %v1186_v31, %v84_v30  ;;  %vm91_vm0 = vweird.f32 %v1186_v31 }
  0xb4   :  { %vm92_vm2 = vmor %vm90_vm1, %vm91_vm0 }
  0xb5   :  { %v87_v33 = vsub.f32 1.0, %v86_v32 }
  0xb7   :  { %v88_v35 = vmul.f32 %v1186_v31, %v87_v33 }
  0xb9   :  { %v89_v37 = vadd.f32 %v1186_v31, %v88_v35 }
  0xbb   :  { %v93_v40 = vsel %vm92_vm2, %v1186_v31, %v89_v37 }
  0xbc   :  { %v98_v41 = vsel %vm95_vm3, %v97_v39, %v93_v40  ;;  %v1105_v40 = vld [vmem:[%s1772_s8 + $0x8] sm:$0xff] }
  0xbd   :  { %vm100_vm5 = vcmp.lt.f32.partialorder %v57_v38, %v98_v41 }
  0xbe   :  { %v1098_v43 = vsel %vm100_vm5, 1.0, %v1321_v42 }
  0xbf   :  { %1099 = vmatmul.msk.f32.vlgmr.msra.gmra.mxu1 %vm117_vm4, %v1098_v43  ;;  %118 = vst.msk [vmem:[#allocation2] sm:$0xff] %vm117_vm4, %v1098_v43 }
  0xc0   :  { %564 = vmatpush.msra.mxu1 %v1535_v44  ;;  %1075 = dma.vmem_to_hbm [thread:$0]  %s1071_s14, 128, %s1073_s12, [#allocation3]  }
  0xc2   :  { %565 = vmatpush.msra.mxu1 %v1540_v45 }
  0xc4   :  { %566 = vmatpush.msra.mxu1 %v1547_v46 }
  0xc6   :  { %567 = vmatpush.msra.mxu1 %v1554_v47 }
 0x13c   :  { %v146_v49 = vpop.f32.mrf.mxu1 }
 0x13d   :  { %v147_v50 = vadd.f32 %v1567_v48, %v146_v49 }
 0x13f   :  { %v1100_v51 = vmul.f32 -1.442695, %v147_v50 }
 0x141   :  { %1187 = vpow2.f32 %v1100_v51 }
 0x147   :  { %v1188_v52 = vpop.eup %1187 }
 0x148   :  { %v152_v53 = vadd.f32 1.0, %v1188_v52 }
 0x14a   :  { %1189 = vrcp.f32 %v152_v53  ;;  %v164_v57 = vand.u32 2147483648, %v152_v53  ;;  %v162_v59 = vand.u32 2147483647, %v152_v53  ;;  %vm158_vm7 = vweird.f32 %v152_v53 }
 0x14c   :  { %v165_v62 = vor.u32 1.1754944e-38, %v164_v57  ;;  %vm163_vm9 = vcmp.eq.f32.partialorder %v162_v59, 8.507059e+37 }
 0x150   :  { %v1190_v54 = vpop.eup %1189 }
 0x151   :  { %v154_v55 = vmul.f32 %v1190_v54, %v152_v53  ;;  %vm159_vm6 = vweird.f32 %v1190_v54 }
 0x152   :  { %vm160_vm8 = vmor %vm158_vm7, %vm159_vm6 }
 0x153   :  { %v155_v56 = vsub.f32 1.0, %v154_v55 }
 0x155   :  { %v156_v58 = vmul.f32 %v1190_v54, %v155_v56 }
 0x157   :  { %v157_v60 = vadd.f32 %v1190_v54, %v156_v58 }
 0x159   :  { %v161_v63 = vsel %vm160_vm8, %v1190_v54, %v157_v60 }
 0x15a   :  { %v166_v0 = vsel %vm163_vm9, %v165_v62, %v161_v63  ;;  %v1109_v63 = vld [vmem:[%s1773_s9 + $0x8] sm:$0xff] }
 0x15b   :  { %vm168_vm11 = vcmp.lt.f32.partialorder %v125_v61, %v166_v0 }
 0x15c   :  { %v1101_v1 = vsel %vm168_vm11, 1.0, %v1321_v42 }
 0x15d   :  { %1102 = vmatmul.msk.f32.vlgmr.msra.gmra.mxu2 %vm172_vm10, %v1101_v1 }
 0x15e   :  { %376 = vmatpush.msra.mxu2 %v1535_v44 }
 0x160   :  { %377 = vmatpush.msra.mxu2 %v1540_v45 }
 0x162   :  { %378 = vmatpush.msra.mxu2 %v1547_v46 }
 0x164   :  { %379 = vmatpush.msra.mxu2 %v1554_v47 }
 0x1e0   :  { %v193_v3 = vpop.f32.mrf.mxu2 }
 0x1e1   :  { %v194_v4 = vadd.f32 %v1582_v2, %v193_v3 }
 0x1e3   :  { %v1103_v5 = vmul.f32 -1.442695, %v194_v4 }
 0x1e5   :  { %1191 = vpow2.f32 %v1103_v5 }
 0x1eb   :  { %v1192_v6 = vpop.eup %1191 }
 0x1ec   :  { %v199_v7 = vadd.f32 1.0, %v1192_v6 }
 0x1ee   :  { %1193 = vrcp.f32 %v199_v7  ;;  %v211_v11 = vand.u32 2147483648, %v199_v7  ;;  %v209_v13 = vand.u32 2147483647, %v199_v7  ;;  %vm205_vm13 = vweird.f32 %v199_v7 }
 0x1f0   :  { %v212_v16 = vor.u32 1.1754944e-38, %v211_v11  ;;  %vm210_vm15 = vcmp.eq.f32.partialorder %v209_v13, 8.507059e+37 }
 0x1f4   :  { %v1194_v8 = vpop.eup %1193 }
 0x1f5   :  { %v201_v9 = vmul.f32 %v1194_v8, %v199_v7  ;;  %vm206_vm12 = vweird.f32 %v1194_v8 }
 0x1f6   :  { %vm207_vm14 = vmor %vm205_vm13, %vm206_vm12 }
 0x1f7   :  { %v202_v10 = vsub.f32 1.0, %v201_v9 }
 0x1f9   :  { %v203_v12 = vmul.f32 %v1194_v8, %v202_v10 }
 0x1fb   :  { %v204_v14 = vadd.f32 %v1194_v8, %v203_v12 }
 0x1fd   :  { %v208_v25 = vsel %vm207_vm14, %v1194_v8, %v204_v14 }
 0x1fe   :  { %v213_v26 = vsel %vm210_vm15, %v212_v16, %v208_v25  ;;  %v1113_v25 = vld [vmem:[%s1772_s8 + $0x10] sm:$0xff] }
 0x1ff   :  { %vm215_vm0 = vcmp.lt.f32.partialorder %v171_v15, %v213_v26 }
 0x200   :  { %v1104_v27 = vsel %vm215_vm0, 1.0, %v1321_v42 }
 0x201   :  { %1106 = vmatmul.msk.f32.vlgmr.msra.gmra.mxu3 %vm117_vm4, %v1104_v27 }
 0x202   :  { %658 = vmatpush.msra.mxu3 %v1535_v44 }
 0x204   :  { %659 = vmatpush.msra.mxu3 %v1540_v45 }
 0x206   :  { %660 = vmatpush.msra.mxu3 %v1547_v46 }
 0x208   :  { %661 = vmatpush.msra.mxu3 %v1554_v47 }
 0x284   :  { %v240_v28 = vpop.f32.mrf.mxu3 }
 0x285   :  { %v241_v29 = vadd.f32 %v1567_v48, %v240_v28 }
 0x287   :  { %v1107_v30 = vmul.f32 -1.442695, %v241_v29 }
 0x289   :  { %1195 = vpow2.f32 %v1107_v30 }
 0x28f   :  { %v1196_v31 = vpop.eup %1195 }
 0x290   :  { %v246_v32 = vadd.f32 1.0, %v1196_v31 }
 0x292   :  { %1197 = vrcp.f32 %v246_v32  ;;  %v258_v36 = vand.u32 2147483648, %v246_v32  ;;  %v256_v38 = vand.u32 2147483647, %v246_v32  ;;  %vm252_vm2 = vweird.f32 %v246_v32 }
 0x294   :  { %v259_v41 = vor.u32 1.1754944e-38, %v258_v36  ;;  %vm257_vm5 = vcmp.eq.f32.partialorder %v256_v38, 8.507059e+37 }
 0x298   :  { %v1198_v33 = vpop.eup %1197 }
 0x299   :  { %v248_v34 = vmul.f32 %v1198_v33, %v246_v32  ;;  %vm253_vm1 = vweird.f32 %v1198_v33 }
 0x29a   :  { %vm254_vm3 = vmor %vm252_vm2, %vm253_vm1 }
 0x29b   :  { %v249_v35 = vsub.f32 1.0, %v248_v34 }
 0x29d   :  { %v250_v37 = vmul.f32 %v1198_v33, %v249_v35 }
 0x29f   :  { %v251_v39 = vadd.f32 %v1198_v33, %v250_v37 }
 0x2a1   :  { %v255_v43 = vsel %vm254_vm3, %v1198_v33, %v251_v39 }
 0x2a2   :  { %v260_v49 = vsel %vm257_vm5, %v259_v41, %v255_v43  ;;  %v1117_v43 = vld [vmem:[%s1773_s9 + $0x10] sm:$0xff] }
 0x2a3   :  { %vm262_vm6 = vcmp.lt.f32.partialorder %v1105_v40, %v260_v49 }
 0x2a4   :  { %v1108_v50 = vsel %vm262_vm6, 1.0, %v1321_v42 }
 0x2a5   :  { %1110 = vmatmul.msk.f32.vlgmr.msrb.gmra.mxu2 %vm172_vm10, %v1108_v50 }
 0x2a6   :  { %470 = vmatpush.msrb.mxu2 %v1535_v44 }
 0x2a8   :  { %471 = vmatpush.msrb.mxu2 %v1540_v45 }
 0x2aa   :  { %472 = vmatpush.msrb.mxu2 %v1547_v46 }
 0x2ac   :  { %473 = vmatpush.msrb.mxu2 %v1554_v47 }
 0x328   :  { %v287_v51 = vpop.f32.mrf.mxu2 }
 0x329   :  { %v288_v52 = vadd.f32 %v1582_v2, %v287_v51 }
 0x32b   :  { %v1111_v53 = vmul.f32 -1.442695, %v288_v52 }
 0x32d   :  { %1199 = vpow2.f32 %v1111_v53 }
 0x333   :  { %v1200_v54 = vpop.eup %1199 }
 0x334   :  { %v293_v55 = vadd.f32 1.0, %v1200_v54 }
 0x336   :  { %1201 = vrcp.f32 %v293_v55  ;;  %v305_v59 = vand.u32 2147483648, %v293_v55  ;;  %v303_v61 = vand.u32 2147483647, %v293_v55  ;;  %vm299_vm8 = vweird.f32 %v293_v55 }
 0x338   :  { %v306_v0 = vor.u32 1.1754944e-38, %v305_v59  ;;  %vm304_vm11 = vcmp.eq.f32.partialorder %v303_v61, 8.507059e+37 }
 0x33c   :  { %v1202_v56 = vpop.eup %1201 }
 0x33d   :  { %v295_v57 = vmul.f32 %v1202_v56, %v293_v55  ;;  %vm300_vm7 = vweird.f32 %v1202_v56 }
 0x33e   :  { %vm301_vm9 = vmor %vm299_vm8, %vm300_vm7 }
 0x33f   :  { %v296_v58 = vsub.f32 1.0, %v295_v57 }
 0x341   :  { %v297_v60 = vmul.f32 %v1202_v56, %v296_v58 }
 0x343   :  { %v298_v62 = vadd.f32 %v1202_v56, %v297_v60 }
 0x345   :  { %v302_v1 = vsel %vm301_vm9, %v1202_v56, %v298_v62 }
 0x346   :  { %v307_v3 = vsel %vm304_vm11, %v306_v0, %v302_v1  ;;  %v1121_v1 = vld [vmem:[%s1772_s8 + $0x18] sm:$0xff] }
 0x347   :  { %vm309_vm12 = vcmp.lt.f32.partialorder %v1109_v63, %v307_v3 }
 0x348   :  { %v1112_v4 = vsel %vm309_vm12, 1.0, %v1321_v42 }
 0x349   :  { %1114 = vmatmul.msk.f32.vlgmr.msrb.gmra.mxu1 %vm117_vm4, %v1112_v4 }
 0x34a   :  { %701 = vmatpush.msrb.mxu1 %v1438_v17 }
 0x34c   :  { %702 = vmatpush.msrb.mxu1 %v1443_v18 }
 0x34e   :  { %703 = vmatpush.msrb.mxu1 %v1450_v19 }
 0x350   :  { %704 = vmatpush.msrb.mxu1 %v1458_v20 }
 0x352   :  { %705 = vmatpush.msrb.mxu1 %v1466_v21 }
 0x354   :  { %706 = vmatpush.msrb.mxu1 %v1474_v22 }
 0x356   :  { %707 = vmatpush.msrb.mxu1 %v1482_v23 }
 0x358   :  { %708 = vmatpush.msrb.mxu1 %v1490_v24 }
 0x3c6   :  { %v334_v5 = vpop.f32.mrf.mxu1 }
 0x3c7   :  { %v335_v6 = vadd.f32 %v1567_v48, %v334_v5 }
 0x3c9   :  { %v1115_v7 = vmul.f32 -1.442695, %v335_v6 }
 0x3cb   :  { %1203 = vpow2.f32 %v1115_v7 }
 0x3d1   :  { %v1204_v8 = vpop.eup %1203 }
 0x3d2   :  { %v340_v9 = vadd.f32 1.0, %v1204_v8 }
 0x3d4   :  { %1205 = vrcp.f32 %v340_v9  ;;  %v352_v13 = vand.u32 2147483648, %v340_v9  ;;  %v350_v15 = vand.u32 2147483647, %v340_v9  ;;  %vm346_vm14 = vweird.f32 %v340_v9 }
 0x3d6   :  { %v353_v26 = vor.u32 1.1754944e-38, %v352_v13  ;;  %vm351_vm0 = vcmp.eq.f32.partialorder %v350_v15, 8.507059e+37 }
 0x3da   :  { %v1206_v10 = vpop.eup %1205 }
 0x3db   :  { %v342_v11 = vmul.f32 %v1206_v10, %v340_v9  ;;  %vm347_vm13 = vweird.f32 %v1206_v10 }
 0x3dc   :  { %vm348_vm15 = vmor %vm346_vm14, %vm347_vm13 }
 0x3dd   :  { %v343_v12 = vsub.f32 1.0, %v342_v11 }
 0x3df   :  { %v344_v14 = vmul.f32 %v1206_v10, %v343_v12 }
 0x3e1   :  { %v345_v16 = vadd.f32 %v1206_v10, %v344_v14 }
 0x3e3   :  { %v349_v27 = vsel %vm348_vm15, %v1206_v10, %v345_v16 }
 0x3e4   :  { %v354_v28 = vsel %vm351_vm0, %v353_v26, %v349_v27  ;;  %v1125_v27 = vld [vmem:[%s1773_s9 + $0x18] sm:$0xff] }
 0x3e5   :  { %vm356_vm1 = vcmp.lt.f32.partialorder %v1113_v25, %v354_v28 }
 0x3e6   :  { %v1116_v29 = vsel %vm356_vm1, 1.0, %v1321_v42 }
 0x3e7   :  { %1118 = vmatmul.msk.f32.vlgmr.msra.gmra.mxu2 %vm172_vm10, %v1116_v29 }
 0x3e8   :  { %607 = vmatpush.msra.mxu2 %v1438_v17 }
 0x3ea   :  { %608 = vmatpush.msra.mxu2 %v1443_v18 }
 0x3ec   :  { %609 = vmatpush.msra.mxu2 %v1450_v19 }
 0x3ee   :  { %610 = vmatpush.msra.mxu2 %v1458_v20 }
 0x3f0   :  { %611 = vmatpush.msra.mxu2 %v1466_v21 }
 0x3f2   :  { %612 = vmatpush.msra.mxu2 %v1474_v22 }
 0x3f4   :  { %613 = vmatpush.msra.mxu2 %v1482_v23 }
 0x3f6   :  { %614 = vmatpush.msra.mxu2 %v1490_v24 }
 0x46a   :  { %v381_v30 = vpop.f32.mrf.mxu2 }
 0x46b   :  { %v382_v31 = vadd.f32 %v1582_v2, %v381_v30 }
 0x46d   :  { %v1119_v32 = vmul.f32 -1.442695, %v382_v31 }
 0x46f   :  { %1207 = vpow2.f32 %v1119_v32 }
 0x475   :  { %v1208_v33 = vpop.eup %1207 }
 0x476   :  { %v387_v34 = vadd.f32 1.0, %v1208_v33 }
 0x478   :  { %1209 = vrcp.f32 %v387_v34  ;;  %v399_v38 = vand.u32 2147483648, %v387_v34  ;;  %v397_v40 = vand.u32 2147483647, %v387_v34  ;;  %vm393_vm3 = vweird.f32 %v387_v34 }
 0x47a   :  { %v400_v49 = vor.u32 1.1754944e-38, %v399_v38  ;;  %vm398_vm6 = vcmp.eq.f32.partialorder %v397_v40, 8.507059e+37 }
 0x47e   :  { %v1210_v35 = vpop.eup %1209 }
 0x47f   :  { %v389_v36 = vmul.f32 %v1210_v35, %v387_v34  ;;  %vm394_vm2 = vweird.f32 %v1210_v35 }
 0x480   :  { %vm395_vm5 = vmor %vm393_vm3, %vm394_vm2 }
 0x481   :  { %v390_v37 = vsub.f32 1.0, %v389_v36 }
 0x483   :  { %v391_v39 = vmul.f32 %v1210_v35, %v390_v37 }
 0x485   :  { %v392_v41 = vadd.f32 %v1210_v35, %v391_v39 }
 0x487   :  { %v396_v50 = vsel %vm395_vm5, %v1210_v35, %v392_v41 }
 0x488   :  { %v401_v51 = vsel %vm398_vm6, %v400_v49, %v396_v50  ;;  %v1129_v50 = vld [vmem:[%s1772_s8 + $0x20] sm:$0xff] }
 0x489   :  { %vm403_vm7 = vcmp.lt.f32.partialorder %v1117_v43, %v401_v51 }
 0x48a   :  { %v1120_v52 = vsel %vm403_vm7, 1.0, %v1321_v42 }
 0x48b   :  { %1122 = vmatmul.msk.f32.vlgmr.msrb.gmra.mxu3 %vm117_vm4, %v1120_v52 }
 0x48c   :  { %752 = vmatpush.msrb.mxu3 %v1535_v44 }
 0x48e   :  { %753 = vmatpush.msrb.mxu3 %v1540_v45 }
 0x490   :  { %754 = vmatpush.msrb.mxu3 %v1547_v46 }
 0x492   :  { %755 = vmatpush.msrb.mxu3 %v1554_v47 }
 0x50e   :  { %v428_v53 = vpop.f32.mrf.mxu3 }
 0x50f   :  { %v429_v54 = vadd.f32 %v1567_v48, %v428_v53 }
 0x511   :  { %v1123_v55 = vmul.f32 -1.442695, %v429_v54 }
 0x513   :  { %1211 = vpow2.f32 %v1123_v55 }
 0x519   :  { %v1212_v56 = vpop.eup %1211 }
 0x51a   :  { %v434_v57 = vadd.f32 1.0, %v1212_v56 }
 0x51c   :  { %1213 = vrcp.f32 %v434_v57  ;;  %v446_v61 = vand.u32 2147483648, %v434_v57  ;;  %v444_v63 = vand.u32 2147483647, %v434_v57  ;;  %vm440_vm9 = vweird.f32 %v434_v57 }
 0x51e   :  { %v447_v3 = vor.u32 1.1754944e-38, %v446_v61  ;;  %vm445_vm12 = vcmp.eq.f32.partialorder %v444_v63, 8.507059e+37 }
 0x522   :  { %v1214_v58 = vpop.eup %1213 }
 0x523   :  { %v436_v59 = vmul.f32 %v1214_v58, %v434_v57  ;;  %vm441_vm8 = vweird.f32 %v1214_v58 }
 0x524   :  { %vm442_vm11 = vmor %vm440_vm9, %vm441_vm8 }
 0x525   :  { %v437_v60 = vsub.f32 1.0, %v436_v59 }
 0x527   :  { %v438_v62 = vmul.f32 %v1214_v58, %v437_v60 }
 0x529   :  { %v439_v0 = vadd.f32 %v1214_v58, %v438_v62 }
 0x52b   :  { %v443_v4 = vsel %vm442_vm11, %v1214_v58, %v439_v0 }
 0x52c   :  { %v448_v5 = vsel %vm445_vm12, %v447_v3, %v443_v4 }
 0x52d   :  { %vm450_vm13 = vcmp.lt.f32.partialorder %v1121_v1, %v448_v5 }
 0x52e   :  { %v1124_v6 = vsel %vm450_vm13, 1.0, %v1321_v42 }
 0x52f   :  { %1126 = vmatmul.msk.f32.vlgmr.msrb.gmra.mxu2 %vm172_vm10, %v1124_v6 }
 0x530   :  { %846 = vmatpush.msrb.mxu2 %v1535_v44 }
 0x532   :  { %847 = vmatpush.msrb.mxu2 %v1540_v45 }
 0x534   :  { %848 = vmatpush.msrb.mxu2 %v1547_v46 }
 0x536   :  { %849 = vmatpush.msrb.mxu2 %v1554_v47 }
 0x5b2   :  { %v475_v7 = vpop.f32.mrf.mxu2 }
 0x5b3   :  { %v476_v8 = vadd.f32 %v1582_v2, %v475_v7 }
 0x5b5   :  { %v1127_v9 = vmul.f32 -1.442695, %v476_v8 }
 0x5b7   :  { %1215 = vpow2.f32 %v1127_v9 }
 0x5bd   :  { %v1216_v10 = vpop.eup %1215 }
 0x5be   :  { %v481_v11 = vadd.f32 1.0, %v1216_v10 }
 0x5c0   :  { %1217 = vrcp.f32 %v481_v11  ;;  %v493_v15 = vand.u32 2147483648, %v481_v11  ;;  %v491_v25 = vand.u32 2147483647, %v481_v11  ;;  %vm487_vm15 = vweird.f32 %v481_v11 }
 0x5c2   :  { %v494_v28 = vor.u32 1.1754944e-38, %v493_v15  ;;  %vm492_vm1 = vcmp.eq.f32.partialorder %v491_v25, 8.507059e+37  ;;  %v1137_v25 = vld [vmem:[%s1772_s8 + $0x28] sm:$0xff] }
 0x5c6   :  { %v1218_v12 = vpop.eup %1217 }
 0x5c7   :  { %v483_v13 = vmul.f32 %v1218_v12, %v481_v11  ;;  %vm488_vm14 = vweird.f32 %v1218_v12 }
 0x5c8   :  { %vm489_vm0 = vmor %vm487_vm15, %vm488_vm14 }
 0x5c9   :  { %v484_v14 = vsub.f32 1.0, %v483_v13 }
 0x5cb   :  { %v485_v16 = vmul.f32 %v1218_v12, %v484_v14 }
 0x5cd   :  { %v486_v26 = vadd.f32 %v1218_v12, %v485_v16 }
 0x5cf   :  { %v490_v29 = vsel %vm489_vm0, %v1218_v12, %v486_v26 }
 0x5d0   :  { %v495_v30 = vsel %vm492_vm1, %v494_v28, %v490_v29 }
 0x5d1   :  { %vm497_vm2 = vcmp.lt.f32.partialorder %v1125_v27, %v495_v30 }
 0x5d2   :  { %v1128_v31 = vsel %vm497_vm2, 1.0, %v1321_v42 }
 0x5d3   :  { %1130 = vmatmul.msk.f32.vlgmr.msrb.gmra.mxu0 %vm117_vm4, %v1128_v31 }
 0x5d4   :  { %1034 = vmatpush.msrb.mxu0 %v1535_v44 }
 0x5d6   :  { %1035 = vmatpush.msrb.mxu0 %v1540_v45 }
 0x5d8   :  { %1036 = vmatpush.msrb.mxu0 %v1547_v46 }
 0x5da   :  { %1037 = vmatpush.msrb.mxu0 %v1554_v47 }
 0x650   :  { %v522_v32 = vpop.f32.mrf.mxu0 }
 0x651   :  { %v523_v33 = vadd.f32 %v1567_v48, %v522_v32 }
 0x653   :  { %v1131_v34 = vmul.f32 -1.442695, %v523_v33 }
 0x655   :  { %1219 = vpow2.f32 %v1131_v34 }
 0x65b   :  { %v1220_v35 = vpop.eup %1219 }
 0x65c   :  { %v528_v36 = vadd.f32 1.0, %v1220_v35 }
 0x65e   :  { %1221 = vrcp.f32 %v528_v36  ;;  %v540_v40 = vand.u32 2147483648, %v528_v36  ;;  %v538_v43 = vand.u32 2147483647, %v528_v36  ;;  %vm534_vm5 = vweird.f32 %v528_v36 }
 0x660   :  { %v541_v51 = vor.u32 1.1754944e-38, %v540_v40  ;;  %vm539_vm7 = vcmp.eq.f32.partialorder %v538_v43, 8.507059e+37 }
 0x664   :  { %v1222_v37 = vpop.eup %1221 }
 0x665   :  { %v530_v38 = vmul.f32 %v1222_v37, %v528_v36  ;;  %vm535_vm3 = vweird.f32 %v1222_v37 }
 0x666   :  { %vm536_vm6 = vmor %vm534_vm5, %vm535_vm3 }
 0x667   :  { %v531_v39 = vsub.f32 1.0, %v530_v38 }
 0x669   :  { %v532_v41 = vmul.f32 %v1222_v37, %v531_v39 }
 0x66b   :  { %v533_v49 = vadd.f32 %v1222_v37, %v532_v41 }
 0x66d   :  { %v537_v52 = vsel %vm536_vm6, %v1222_v37, %v533_v49 }
 0x66e   :  { %v542_v53 = vsel %vm539_vm7, %v541_v51, %v537_v52 }
 0x66f   :  { %vm544_vm8 = vcmp.lt.f32.partialorder %v1129_v50, %v542_v53 }
 0x670   :  { %v1132_v54 = vsel %vm544_vm8, 1.0, %v1321_v42 }
 0x671   :  { %1134 = vmatmul.msk.f32.vlgmr.msra.gmra.mxu1 %vm172_vm10, %v1132_v54 }
 0x672   :  { %940 = vmatpush.msra.mxu1 %v1535_v44 }
 0x674   :  { %941 = vmatpush.msra.mxu1 %v1540_v45 }
 0x676   :  { %942 = vmatpush.msra.mxu1 %v1547_v46  ;;  %v1133_v46 = vld [vmem:[%s1773_s9 + $0x20] sm:$0xff] }
 0x678   :  { %943 = vmatpush.msra.mxu1 %v1554_v47 }
 0x6ee   :  { %v569_v55 = vpop.f32.mrf.mxu1 }
 0x6ef   :  { %v570_v56 = vadd.f32 %v1582_v2, %v569_v55 }
 0x6f1   :  { %v1135_v57 = vmul.f32 -1.442695, %v570_v56 }
 0x6f3   :  { %1223 = vpow2.f32 %v1135_v57  ;;  %v1145_v57 = vld [vmem:[%s1772_s8 + $0x30] sm:$0xff] }
 0x6f9   :  { %v1224_v58 = vpop.eup %1223 }
 0x6fa   :  { %v575_v59 = vadd.f32 1.0, %v1224_v58 }
 0x6fc   :  { %1225 = vrcp.f32 %v575_v59  ;;  %v587_v63 = vand.u32 2147483648, %v575_v59  ;;  %v585_v44 = vand.u32 2147483647, %v575_v59  ;;  %vm581_vm11 = vweird.f32 %v575_v59 }
 0x6fe   :  { %v588_v47 = vor.u32 1.1754944e-38, %v587_v63  ;;  %vm586_vm13 = vcmp.eq.f32.partialorder %v585_v44, 8.507059e+37 }
 0x702   :  { %v1226_v60 = vpop.eup %1225 }
 0x703   :  { %v577_v61 = vmul.f32 %v1226_v60, %v575_v59  ;;  %vm582_vm9 = vweird.f32 %v1226_v60 }
 0x704   :  { %vm583_vm12 = vmor %vm581_vm11, %vm582_vm9 }
 0x705   :  { %v578_v62 = vsub.f32 1.0, %v577_v61 }
 0x707   :  { %v579_v0 = vmul.f32 %v1226_v60, %v578_v62 }
 0x709   :  { %v580_v45 = vadd.f32 %v1226_v60, %v579_v0 }
 0x70b   :  { %v584_v1 = vsel %vm583_vm12, %v1226_v60, %v580_v45 }
 0x70c   :  { %v589_v3 = vsel %vm586_vm13, %v588_v47, %v584_v1 }
 0x70d   :  { %vm591_vm14 = vcmp.lt.f32.partialorder %v1133_v46, %v589_v3 }
 0x70e   :  { %v1136_v4 = vsel %vm591_vm14, 1.0, %v1321_v42 }
 0x70f   :  { %1138 = vmatmul.msk.f32.vlgmr.msra.gmra.mxu2 %vm117_vm4, %v1136_v4 }
 0x710   :  { %983 = vmatpush.msra.mxu2 %v1438_v17 }
 0x712   :  { %984 = vmatpush.msra.mxu2 %v1443_v18 }
 0x714   :  { %985 = vmatpush.msra.mxu2 %v1450_v19 }
 0x716   :  { %986 = vmatpush.msra.mxu2 %v1458_v20 }
 0x718   :  { %987 = vmatpush.msra.mxu2 %v1466_v21 }
 0x71a   :  { %988 = vmatpush.msra.mxu2 %v1474_v22 }
 0x71c   :  { %989 = vmatpush.msra.mxu2 %v1482_v23 }
 0x71e   :  { %990 = vmatpush.msra.mxu2 %v1490_v24 }
 0x792   :  { %v616_v5 = vpop.f32.mrf.mxu2 }
 0x793   :  { %v617_v6 = vadd.f32 %v1567_v48, %v616_v5 }
 0x795   :  { %v1139_v7 = vmul.f32 -1.442695, %v617_v6 }
 0x797   :  { %1227 = vpow2.f32 %v1139_v7  ;;  %v1149_v7 = vld [vmem:[%s1773_s9 + $0x30] sm:$0xff] }
 0x79d   :  { %v1228_v8 = vpop.eup %1227 }
 0x79e   :  { %v622_v9 = vadd.f32 1.0, %v1228_v8 }
 0x7a0   :  { %1229 = vrcp.f32 %v622_v9  ;;  %v634_v13 = vand.u32 2147483648, %v622_v9  ;;  %v632_v15 = vand.u32 2147483647, %v622_v9  ;;  %vm628_vm0 = vweird.f32 %v622_v9 }
 0x7a2   :  { %v635_v26 = vor.u32 1.1754944e-38, %v634_v13  ;;  %vm633_vm2 = vcmp.eq.f32.partialorder %v632_v15, 8.507059e+37 }
 0x7a6   :  { %v1230_v10 = vpop.eup %1229 }
 0x7a7   :  { %v624_v11 = vmul.f32 %v1230_v10, %v622_v9  ;;  %vm629_vm15 = vweird.f32 %v1230_v10 }
 0x7a8   :  { %vm630_vm1 = vmor %vm628_vm0, %vm629_vm15 }
 0x7a9   :  { %v625_v12 = vsub.f32 1.0, %v624_v11 }
 0x7ab   :  { %v626_v14 = vmul.f32 %v1230_v10, %v625_v12 }
 0x7ad   :  { %v627_v16 = vadd.f32 %v1230_v10, %v626_v14 }
 0x7af   :  { %v631_v27 = vsel %vm630_vm1, %v1230_v10, %v627_v16 }
 0x7b0   :  { %v636_v28 = vsel %vm633_vm2, %v635_v26, %v631_v27 }
 0x7b1   :  { %vm638_vm3 = vcmp.lt.f32.partialorder %v1137_v25, %v636_v28 }
 0x7b2   :  { %v1140_v29 = vsel %vm638_vm3, 1.0, %v1321_v42 }
 0x7b3   :  { %1142 = vmatmul.msk.f32.vlgmr.msra.gmra.mxu3 %vm172_vm10, %v1140_v29 }
 0x7b4   :  { %889 = vmatpush.msra.mxu3 %v1438_v17 }
 0x7b6   :  { %890 = vmatpush.msra.mxu3 %v1443_v18 }
 0x7b8   :  { %891 = vmatpush.msra.mxu3 %v1450_v19 }
 0x7ba   :  { %892 = vmatpush.msra.mxu3 %v1458_v20 }
 0x7bc   :  { %893 = vmatpush.msra.mxu3 %v1466_v21 }
 0x7be   :  { %894 = vmatpush.msra.mxu3 %v1474_v22 }
 0x7c0   :  { %895 = vmatpush.msra.mxu3 %v1482_v23  ;;  %v1141_v23 = vld [vmem:[%s1773_s9 + $0x28] sm:$0xff] }
 0x7c2   :  { %896 = vmatpush.msra.mxu3 %v1490_v24 }
 0x836   :  { %v663_v30 = vpop.f32.mrf.mxu3 }
 0x837   :  { %v664_v31 = vadd.f32 %v1582_v2, %v663_v30 }
 0x839   :  { %v1143_v32 = vmul.f32 -1.442695, %v664_v31 }
 0x83b   :  { %1231 = vpow2.f32 %v1143_v32  ;;  %v1153_v32 = vld [vmem:[%s1772_s8 + $0x38] sm:$0xff] }
 0x841   :  { %v1232_v17 = vpop.eup %1231 }
 0x842   :  { %v669_v33 = vadd.f32 1.0, %v1232_v17 }
 0x844   :  { %1233 = vrcp.f32 %v669_v33  ;;  %v681_v20 = vand.u32 2147483648, %v669_v33  ;;  %v679_v21 = vand.u32 2147483647, %v669_v33  ;;  %vm675_vm6 = vweird.f32 %v669_v33 }
 0x846   :  { %v682_v24 = vor.u32 1.1754944e-38, %v681_v20  ;;  %vm680_vm8 = vcmp.eq.f32.partialorder %v679_v21, 8.507059e+37 }
 0x84a   :  { %v1234_v18 = vpop.eup %1233 }
 0x84b   :  { %v671_v19 = vmul.f32 %v1234_v18, %v669_v33  ;;  %vm676_vm5 = vweird.f32 %v1234_v18 }
 0x84c   :  { %vm677_vm7 = vmor %vm675_vm6, %vm676_vm5 }
 0x84d   :  { %v672_v34 = vsub.f32 1.0, %v671_v19 }
 0x84f   :  { %v673_v35 = vmul.f32 %v1234_v18, %v672_v34 }
 0x851   :  { %v674_v22 = vadd.f32 %v1234_v18, %v673_v35 }
 0x853   :  { %v678_v36 = vsel %vm677_vm7, %v1234_v18, %v674_v22 }
 0x854   :  { %v683_v37 = vsel %vm680_vm8, %v682_v24, %v678_v36 }
 0x855   :  { %vm685_vm9 = vcmp.lt.f32.partialorder %v1141_v23, %v683_v37 }
 0x856   :  { %v1144_v38 = vsel %vm685_vm9, 1.0, %v1321_v42 }
 0x857   :  { %1146 = vmatmul.msk.f32.vlgmr.msrb.gmra.mxu1 %vm117_vm4, %v1144_v38 }
 0x8d4   :  { %v710_v39 = vpop.f32.mrf.mxu1 }
 0x8d5   :  { %v711_v40 = vadd.f32 %v1567_v48, %v710_v39 }
 0x8d7   :  { %v1147_v41 = vmul.f32 -1.442695, %v711_v40 }
 0x8d9   :  { %1235 = vpow2.f32 %v1147_v41  ;;  %v1157_v41 = vld [vmem:[%s1773_s9 + $0x38] sm:$0xff] }
 0x8df   :  { %v1236_v43 = vpop.eup %1235 }
 0x8e0   :  { %v716_v49 = vadd.f32 1.0, %v1236_v43 }
 0x8e2   :  { %1237 = vrcp.f32 %v716_v49  ;;  %v728_v53 = vand.u32 2147483648, %v716_v49  ;;  %v726_v55 = vand.u32 2147483647, %v716_v49  ;;  %vm722_vm12 = vweird.f32 %v716_v49 }
 0x8e4   :  { %v729_v58 = vor.u32 1.1754944e-38, %v728_v53  ;;  %vm727_vm14 = vcmp.eq.f32.partialorder %v726_v55, 8.507059e+37 }
 0x8e8   :  { %v1238_v50 = vpop.eup %1237 }
 0x8e9   :  { %v718_v51 = vmul.f32 %v1238_v50, %v716_v49  ;;  %vm723_vm11 = vweird.f32 %v1238_v50 }
 0x8ea   :  { %vm724_vm13 = vmor %vm722_vm12, %vm723_vm11 }
 0x8eb   :  { %v719_v52 = vsub.f32 1.0, %v718_v51 }
 0x8ed   :  { %v720_v54 = vmul.f32 %v1238_v50, %v719_v52 }
 0x8ef   :  { %v721_v56 = vadd.f32 %v1238_v50, %v720_v54 }
 0x8f1   :  { %v725_v59 = vsel %vm724_vm13, %v1238_v50, %v721_v56 }
 0x8f2   :  { %v730_v60 = vsel %vm727_vm14, %v729_v58, %v725_v59 }
 0x8f3   :  { %vm732_vm15 = vcmp.lt.f32.partialorder %v1145_v57, %v730_v60 }
 0x8f4   :  { %v1148_v61 = vsel %vm732_vm15, 1.0, %v1321_v42 }
 0x8f5   :  { %1150 = vmatmul.msk.f32.vlgmr.msrb.gmra.mxu3 %vm172_vm10, %v1148_v61 }
 0x978   :  { %v757_v62 = vpop.f32.mrf.mxu3 }
 0x979   :  { %v758_v63 = vadd.f32 %v1582_v2, %v757_v62 }
 0x97b   :  { %v1151_v0 = vmul.f32 -1.442695, %v758_v63 }
 0x97d   :  { %1239 = vpow2.f32 %v1151_v0  ;;  %v1161_v0 = vld [vmem:[%s1772_s8 + $0x40] sm:$0xff] }
 0x983   :  { %v1240_v44 = vpop.eup %1239 }
 0x984   :  { %v763_v45 = vadd.f32 1.0, %v1240_v44 }
 0x986   :  { %1241 = vrcp.f32 %v763_v45  ;;  %v775_v3 = vand.u32 2147483648, %v763_v45  ;;  %v773_v5 = vand.u32 2147483647, %v763_v45  ;;  %vm769_vm1 = vweird.f32 %v763_v45 }
 0x988   :  { %v776_v8 = vor.u32 1.1754944e-38, %v775_v3  ;;  %vm774_vm3 = vcmp.eq.f32.partialorder %v773_v5, 8.507059e+37 }
 0x98c   :  { %v1242_v46 = vpop.eup %1241 }
 0x98d   :  { %v765_v47 = vmul.f32 %v1242_v46, %v763_v45  ;;  %vm770_vm0 = vweird.f32 %v1242_v46 }
 0x98e   :  { %vm771_vm2 = vmor %vm769_vm1, %vm770_vm0 }
 0x98f   :  { %v766_v1 = vsub.f32 1.0, %v765_v47 }
 0x991   :  { %v767_v4 = vmul.f32 %v1242_v46, %v766_v1 }
 0x993   :  { %v768_v6 = vadd.f32 %v1242_v46, %v767_v4 }
 0x995   :  { %v772_v9 = vsel %vm771_vm2, %v1242_v46, %v768_v6 }
 0x996   :  { %v777_v10 = vsel %vm774_vm3, %v776_v8, %v772_v9 }
 0x997   :  { %vm779_vm5 = vcmp.lt.f32.partialorder %v1149_v7, %v777_v10 }
 0x998   :  { %v1152_v11 = vsel %vm779_vm5, 1.0, %v1321_v42 }
 0x999   :  { %1154 = vmatmul.msk.f32.vlgmr.msra.gmra.mxu0 %vm117_vm4, %v1152_v11 }
 0xa16   :  { %v804_v12 = vpop.f32.mrf.mxu0 }
 0xa17   :  { %v805_v13 = vadd.f32 %v1567_v48, %v804_v12 }
 0xa19   :  { %v1155_v14 = vmul.f32 -1.442695, %v805_v13  ;;  %v1165_v13 = vld [vmem:[%s1773_s9 + $0x40] sm:$0xff] }
 0xa1b   :  { %1243 = vpow2.f32 %v1155_v14 }
 0xa21   :  { %v1244_v15 = vpop.eup %1243 }
 0xa22   :  { %v810_v16 = vadd.f32 1.0, %v1244_v15 }
 0xa24   :  { %1245 = vrcp.f32 %v810_v16  ;;  %v822_v28 = vand.u32 2147483648, %v810_v16  ;;  %v820_v30 = vand.u32 2147483647, %v810_v16  ;;  %vm816_vm7 = vweird.f32 %v810_v16 }
 0xa26   :  { %v823_v17 = vor.u32 1.1754944e-38, %v822_v28  ;;  %vm821_vm9 = vcmp.eq.f32.partialorder %v820_v30, 8.507059e+37 }
 0xa2a   :  { %v1246_v25 = vpop.eup %1245 }
 0xa2b   :  { %v812_v26 = vmul.f32 %v1246_v25, %v810_v16  ;;  %vm817_vm6 = vweird.f32 %v1246_v25 }
 0xa2c   :  { %vm818_vm8 = vmor %vm816_vm7, %vm817_vm6 }
 0xa2d   :  { %v813_v27 = vsub.f32 1.0, %v812_v26  ;;  %v1267_v26 = vld [vmem:[%s1771_s7] ss:$0 sm:$0xff] }
 0xa2f   :  { %v814_v29 = vmul.f32 %v1246_v25, %v813_v27 }
 0xa31   :  { %v815_v31 = vadd.f32 %v1246_v25, %v814_v29 }
 0xa33   :  { %v819_v33 = vsel %vm818_vm8, %v1246_v25, %v815_v31 }
 0xa34   :  { %v824_v18 = vsel %vm821_vm9, %v823_v17, %v819_v33 }
 0xa35   :  { %vm826_vm11 = vcmp.lt.f32.partialorder %v1153_v32, %v824_v18 }
 0xa36   :  { %v1156_v19 = vsel %vm826_vm11, 1.0, %v1321_v42 }
 0xa37   :  { %1158 = vmatmul.msk.f32.vlgmr.msrb.gmra.mxu2 %vm172_vm10, %v1156_v19 }
 0xaba   :  { %v851_v34 = vpop.f32.mrf.mxu2 }
 0xabb   :  { %v852_v20 = vadd.f32 %v1582_v2, %v851_v34 }
 0xabd   :  { %v1159_v35 = vmul.f32 -1.442695, %v852_v20  ;;  %v1169_v20 = vld [vmem:[%s1772_s8 + $0x48] sm:$0xff] }
 0xabf   :  { %1247 = vpow2.f32 %v1159_v35 }
 0xac5   :  { %v1248_v21 = vpop.eup %1247 }
 0xac6   :  { %v857_v22 = vadd.f32 1.0, %v1248_v21 }
 0xac8   :  { %1249 = vrcp.f32 %v857_v22  ;;  %v869_v37 = vand.u32 2147483648, %v857_v22  ;;  %v867_v39 = vand.u32 2147483647, %v857_v22  ;;  %vm863_vm13 = vweird.f32 %v857_v22 }
 0xaca   :  { %v870_v43 = vor.u32 1.1754944e-38, %v869_v37  ;;  %vm868_vm15 = vcmp.eq.f32.partialorder %v867_v39, 8.507059e+37 }
 0xace   :  { %v1250_v23 = vpop.eup %1249 }
 0xacf   :  { %v859_v24 = vmul.f32 %v1250_v23, %v857_v22  ;;  %vm864_vm12 = vweird.f32 %v1250_v23 }
 0xad0   :  { %vm865_vm14 = vmor %vm863_vm13, %vm864_vm12 }
 0xad1   :  { %v860_v36 = vsub.f32 1.0, %v859_v24 }
 0xad3   :  { %v861_v38 = vmul.f32 %v1250_v23, %v860_v36  ;;  %v1268_v36 = vld [vmem:[%s1770_s6] ss:$0 sm:$0xff]  ;;  %s1323_s6 = smov [#allocation4]  }
 0xad4   :  { %s1081_s1 = sshll.u32 %s1323_s6, 4  ;;  %s1082_s1 = int_to_ptr.vmem [resolvable:$true] %s1081_s1 }
 0xad5   :  { %v862_v40 = vadd.f32 %v1250_v23, %v861_v38 }
 0xad7   :  { %v866_v49 = vsel %vm865_vm14, %v1250_v23, %v862_v40 }
 0xad8   :  { %v871_v50 = vsel %vm868_vm15, %v870_v43, %v866_v49 }
 0xad9   :  { %vm873_vm0 = vcmp.lt.f32.partialorder %v1157_v41, %v871_v50 }
 0xada   :  { %v1160_v51 = vsel %vm873_vm0, 1.0, %v1321_v42 }
 0xadb   :  { %1162 = vmatmul.msk.f32.vlgmr.msra.gmra.mxu3 %vm117_vm4, %v1160_v51 }
 0xb5e   :  { %v898_v52 = vpop.f32.mrf.mxu3 }
 0xb5f   :  { %v899_v53 = vadd.f32 %v1567_v48, %v898_v52 }
 0xb61   :  { %v1163_v54 = vmul.f32 -1.442695, %v899_v53 }
 0xb63   :  { %1251 = vpow2.f32 %v1163_v54  ;;  %v1173_v54 = vld [vmem:[%s1773_s9 + $0x48] sm:$0xff] }
 0xb69   :  { %v1252_v55 = vpop.eup %1251 }
 0xb6a   :  { %v904_v56 = vadd.f32 1.0, %v1252_v55 }
 0xb6c   :  { %1253 = vrcp.f32 %v904_v56  ;;  %v916_v60 = vand.u32 2147483648, %v904_v56  ;;  %v914_v62 = vand.u32 2147483647, %v904_v56  ;;  %vm910_vm2 = vweird.f32 %v904_v56 }
 0xb6e   :  { %v917_v48 = vor.u32 1.1754944e-38, %v916_v60  ;;  %vm915_vm5 = vcmp.eq.f32.partialorder %v914_v62, 8.507059e+37 }
 0xb72   :  { %v1254_v57 = vpop.eup %1253 }
 0xb73   :  { %v906_v58 = vmul.f32 %v1254_v57, %v904_v56  ;;  %vm911_vm1 = vweird.f32 %v1254_v57 }
 0xb74   :  { %vm912_vm3 = vmor %vm910_vm2, %vm911_vm1 }
 0xb75   :  { %v907_v59 = vsub.f32 1.0, %v906_v58 }
 0xb77   :  { %v908_v61 = vmul.f32 %v1254_v57, %v907_v59 }
 0xb79   :  { %v909_v63 = vadd.f32 %v1254_v57, %v908_v61 }
 0xb7b   :  { %v913_v44 = vsel %vm912_vm3, %v1254_v57, %v909_v63 }
 0xb7c   :  { %v918_v45 = vsel %vm915_vm5, %v917_v48, %v913_v44 }
 0xb7d   :  { %vm920_vm6 = vcmp.lt.f32.partialorder %v1161_v0, %v918_v45 }
 0xb7e   :  { %v1164_v46 = vsel %vm920_vm6, 1.0, %v1321_v42 }
 0xb7f   :  { %1166 = vmatmul.msk.f32.vlgmr.msra.gmra.mxu1 %vm172_vm10, %v1164_v46 }
 0xbfc   :  { %v945_v47 = vpop.f32.mrf.mxu1 }
 0xbfd   :  { %v946_v1 = vadd.f32 %v1582_v2, %v945_v47 }
 0xbff   :  { %v1167_v3 = vmul.f32 -1.442695, %v946_v1 }
 0xc01   :  { %1255 = vpow2.f32 %v1167_v3 }
 0xc07   :  { %v1256_v4 = vpop.eup %1255 }
 0xc08   :  { %v951_v5 = vadd.f32 1.0, %v1256_v4 }
 0xc0a   :  { %1257 = vrcp.f32 %v951_v5  ;;  %v963_v9 = vand.u32 2147483648, %v951_v5  ;;  %v961_v11 = vand.u32 2147483647, %v951_v5  ;;  %vm957_vm8 = vweird.f32 %v951_v5 }
 0xc0c   :  { %v964_v2 = vor.u32 1.1754944e-38, %v963_v9  ;;  %vm962_vm11 = vcmp.eq.f32.partialorder %v961_v11, 8.507059e+37 }
 0xc10   :  { %v1258_v6 = vpop.eup %1257 }
 0xc11   :  { %v953_v7 = vmul.f32 %v1258_v6, %v951_v5  ;;  %vm958_vm7 = vweird.f32 %v1258_v6 }
 0xc12   :  { %vm959_vm9 = vmor %vm957_vm8, %vm958_vm7 }
 0xc13   :  { %v954_v8 = vsub.f32 1.0, %v953_v7 }
 0xc15   :  { %v955_v10 = vmul.f32 %v1258_v6, %v954_v8 }
 0xc17   :  { %v956_v12 = vadd.f32 %v1258_v6, %v955_v10 }
 0xc19   :  { %v960_v14 = vsel %vm959_vm9, %v1258_v6, %v956_v12 }
 0xc1a   :  { %v965_v15 = vsel %vm962_vm11, %v964_v2, %v960_v14 }
 0xc1b   :  { %vm967_vm12 = vcmp.lt.f32.partialorder %v1165_v13, %v965_v15 }
 0xc1c   :  { %v1168_v16 = vsel %vm967_vm12, 1.0, %v1321_v42 }
 0xc1d   :  { %1170 = vmatmul.msk.f32.vlgmr.msra.gmra.mxu2 %vm117_vm4, %v1168_v16 }
 0xca0   :  { %v992_v25 = vpop.f32.mrf.mxu2 }
 0xca1   :  { %v993_v27 = vadd.f32 %v1267_v26, %v992_v25 }
 0xca3   :  { %v1171_v28 = vmul.f32 -1.442695, %v993_v27 }
 0xca5   :  { %1259 = vpow2.f32 %v1171_v28 }
 0xcab   :  { %v1260_v29 = vpop.eup %1259 }
 0xcac   :  { %v998_v30 = vadd.f32 1.0, %v1260_v29 }
 0xcae   :  { %1261 = vrcp.f32 %v998_v30  ;;  %v1010_v33 = vand.u32 2147483648, %v998_v30  ;;  %v1008_v19 = vand.u32 2147483647, %v998_v30  ;;  %vm1004_vm14 = vweird.f32 %v998_v30 }
 0xcb0   :  { %v1011_v35 = vor.u32 1.1754944e-38, %v1010_v33  ;;  %vm1009_vm0 = vcmp.eq.f32.partialorder %v1008_v19, 8.507059e+37 }
 0xcb4   :  { %v1262_v31 = vpop.eup %1261 }
 0xcb5   :  { %v1000_v32 = vmul.f32 %v1262_v31, %v998_v30  ;;  %vm1005_vm13 = vweird.f32 %v1262_v31 }
 0xcb6   :  { %vm1006_vm15 = vmor %vm1004_vm14, %vm1005_vm13 }
 0xcb7   :  { %v1001_v17 = vsub.f32 1.0, %v1000_v32 }
 0xcb9   :  { %v1002_v18 = vmul.f32 %v1262_v31, %v1001_v17 }
 0xcbb   :  { %v1003_v34 = vadd.f32 %v1262_v31, %v1002_v18 }
 0xcbd   :  { %v1007_v21 = vsel %vm1006_vm15, %v1262_v31, %v1003_v34 }
 0xcbe   :  { %v1012_v22 = vsel %vm1009_vm0, %v1011_v35, %v1007_v21 }
 0xcbf   :  { %vm1014_vm1 = vcmp.lt.f32.partialorder %v1169_v20, %v1012_v22 }
 0xcc0   :  { %v1172_v23 = vsel %vm1014_vm1, 1.0, %v1321_v42 }
 0xcc1   :  { %1174 = vmatmul.msk.f32.vlgmr.msrb.gmra.mxu0 %vm172_vm10, %v1172_v23 }
 0xd3e   :  { %v1039_v24 = vpop.f32.mrf.mxu0 }
 0xd3f   :  { %v1040_v37 = vadd.f32 %v1268_v36, %v1039_v24 }
 0xd41   :  { %v1175_v38 = vmul.f32 -1.442695, %v1040_v37 }
 0xd43   :  { %1263 = vpow2.f32 %v1175_v38 }
 0xd49   :  { %v1264_v39 = vpop.eup %1263 }
 0xd4a   :  { %v1045_v40 = vadd.f32 1.0, %v1264_v39 }
 0xd4c   :  { %1265 = vrcp.f32 %v1045_v40  ;;  %v1057_v50 = vand.u32 2147483648, %v1045_v40  ;;  %v1055_v52 = vand.u32 2147483647, %v1045_v40  ;;  %vm1051_vm2 = vweird.f32 %v1045_v40 }
 0xd4e   :  { %v1058_v55 = vor.u32 1.1754944e-38, %v1057_v50  ;;  %vm1056_vm5 = vcmp.eq.f32.partialorder %v1055_v52, 8.507059e+37 }
 0xd52   :  { %v1266_v41 = vpop.eup %1265 }
 0xd53   :  { %v1047_v43 = vmul.f32 %v1266_v41, %v1045_v40  ;;  %vm1052_vm10 = vweird.f32 %v1266_v41 }
 0xd54   :  { %vm1053_vm3 = vmor %vm1051_vm2, %vm1052_vm10 }
 0xd55   :  { %v1048_v49 = vsub.f32 1.0, %v1047_v43 }
 0xd57   :  { %v1049_v51 = vmul.f32 %v1266_v41, %v1048_v49 }
 0xd59   :  { %v1050_v53 = vadd.f32 %v1266_v41, %v1049_v51 }
 0xd5b   :  { %v1054_v56 = vsel %vm1053_vm3, %v1266_v41, %v1050_v53 }
 0xd5c   :  { %v1059_v57 = vsel %vm1056_vm5, %v1058_v55, %v1054_v56 }
 0xd5d   :  { %vm1061_vm6 = vcmp.lt.f32.partialorder %v1173_v54, %v1059_v57 }
 0xd5e   :  { %v1176_v58 = vsel %vm1061_vm6, 1.0, %v1321_v42 }
 0xd5f   :  { %1064 = vst.msk [vmem:[#allocation4] sm:$0xff] %vm117_vm4, %v1176_v58 }
 0xd60   :  { %1086 = dma.vmem_to_hbm [thread:$0]  %s1082_s1, 128, %s1084_s0, [#allocation5]  }
 0xd61   :  { %1317 = dma.done.wait [#allocation3], 128  }
 0xd62   :  { %1318 = vsyncadd [#allocation3], 4294967168 }
 0xd63   :  { %1319 = dma.done.wait [#allocation5], 128  }
 0xd64   :  { %1320 = vsyncadd [#allocation5], 4294967168 }
 0xd65   :  { %1095 = vsyncpa [#allocation3], 1 }
 0xd66   :  { %1096 = vsyncpa [#allocation5], 1 }

</bundles_post_ra>
